<compile_context>
chip_gen: v7x
topology: tpu7x:2x2x1
jax: 0.10.0
libtpu: 0.0.40
codegen_flags: <defaults>
</compile_context>

<pallas_src>
import jax
import jax.numpy as jnp
from jax.experimental import pallas as pl
from jax.experimental.pallas import tpu as pltpu


# ----------------------------------------------------------------------------
# Pallas kernels (transposed [Cout, M] layout -> lane-dense outputs)
# ----------------------------------------------------------------------------
def _conv_lrelu_kernel(w_ref, p_ref, o_ref):
    # [Cout, K] @ [K, tm] -> [Cout, tm], fused LeakyReLU(0.2).
    y = jnp.dot(w_ref[...], p_ref[...], preferred_element_type=jnp.float32)
    o_ref[...] = jnp.where(y > 0, y, 0.2 * y)


def conv_lrelu(wT, pT):
    """Conv (as transposed matmul) + LeakyReLU.  wT: [Cout,K], pT: [K,M]."""
    Cout, K = wT.shape
    K2, M = pT.shape
    assert K == K2
    # One or two big M tiles: negligible per-step overhead, and a 2-way
    # "parallel" split lets v7x's two TensorCores share the work.
    tm = M // 2 if (M % 256 == 0) else M
    grid = (M // tm,)
    return pl.pallas_call(
        _conv_lrelu_kernel,
        out_shape=jax.ShapeDtypeStruct((Cout, M), jnp.float32),
        grid=grid,
        in_specs=[
            pl.BlockSpec((Cout, K), lambda i: (0, 0)),
            pl.BlockSpec((K, tm), lambda i: (0, i)),
        ],
        out_specs=pl.BlockSpec((Cout, tm), lambda i: (0, i)),
        compiler_params=pltpu.CompilerParams(
            dimension_semantics=("parallel",)),
    )(wT, pT)


def _conv_bn_lrelu_kernel(w_ref, p_ref, g_ref, b_ref, o_ref):
    # conv matmul + BatchNorm2d (training mode: stats over M = N*H*W, biased
    # variance, eps=1e-5) + LeakyReLU(0.2), all on one [Cout, M] VMEM slab.
    y = jnp.dot(w_ref[...], p_ref[...], preferred_element_type=jnp.float32)
    mean = jnp.mean(y, axis=-1, keepdims=True)
    var = jnp.mean(jnp.square(y - mean), axis=-1, keepdims=True)
    yn = (y - mean) * jax.lax.rsqrt(var + 1e-5)
    yn = yn * g_ref[...] + b_ref[...]
    o_ref[...] = jnp.where(yn > 0, yn, 0.2 * yn)


def conv_bn_lrelu(wT, pT, gamma, beta):
    """Fused Conv + BN + LeakyReLU.  Full M slab in one tile (needed for the
    batch statistics); all slabs here are <= 32x512 f32."""
    Cout, K = wT.shape
    K2, M = pT.shape
    assert K == K2
    return pl.pallas_call(
        _conv_bn_lrelu_kernel,
        out_shape=jax.ShapeDtypeStruct((Cout, M), jnp.float32),
        grid=(1,),
        in_specs=[
            pl.BlockSpec((Cout, K), lambda i: (0, 0)),
            pl.BlockSpec((K, M), lambda i: (0, 0)),
            pl.BlockSpec((Cout, 1), lambda i: (0, 0)),
            pl.BlockSpec((Cout, 1), lambda i: (0, 0)),
        ],
        out_specs=pl.BlockSpec((Cout, M), lambda i: (0, 0)),
        compiler_params=pltpu.CompilerParams(
            dimension_semantics=("arbitrary",)),
    )(wT, pT, gamma.reshape(Cout, 1), beta.reshape(Cout, 1))


def _conv_bn_lrelu_head_kernel(w_ref, p_ref, g_ref, b_ref, w5_ref, m_ref,
                               o_ref):
    # Block 4 (conv + BN + LeakyReLU) fused with block 5 (4x4 full-map conv to
    # 1x1 + sigmoid): the block-4 activation never leaves VMEM.
    y = jnp.dot(w_ref[...], p_ref[...], preferred_element_type=jnp.float32)
    mean = jnp.mean(y, axis=-1, keepdims=True)
    var = jnp.mean(jnp.square(y - mean), axis=-1, keepdims=True)
    yn = (y - mean) * jax.lax.rsqrt(var + 1e-5)
    yn = yn * g_ref[...] + b_ref[...]
    a = jnp.where(yn > 0, yn, 0.2 * yn)                        # [C4, M4]
    # conv5: elementwise multiply by the spatially-tiled w5, reduce channels,
    # then a per-sample (masked) lane reduction -> one logit per sample.
    t = jnp.sum(a * w5_ref[...], axis=0, keepdims=True)        # [1, M4]
    logits = jnp.sum(m_ref[...] * t, axis=-1, keepdims=True)   # [N, 1]
    o_ref[...] = 1.0 / (1.0 + jnp.exp(-logits))


def conv_bn_lrelu_head(wT, pT, gamma, beta, w5_full, mask):
    Cout, K = wT.shape
    K2, M = pT.shape
    N = mask.shape[0]
    assert K == K2
    return pl.pallas_call(
        _conv_bn_lrelu_head_kernel,
        out_shape=jax.ShapeDtypeStruct((N, 1), jnp.float32),
        grid=(1,),
        in_specs=[
            pl.BlockSpec((Cout, K), lambda i: (0, 0)),
            pl.BlockSpec((K, M), lambda i: (0, 0)),
            pl.BlockSpec((Cout, 1), lambda i: (0, 0)),
            pl.BlockSpec((Cout, 1), lambda i: (0, 0)),
            pl.BlockSpec((Cout, M), lambda i: (0, 0)),
            pl.BlockSpec((N, M), lambda i: (0, 0)),
        ],
        out_specs=pl.BlockSpec((N, 1), lambda i: (0, 0)),
        compiler_params=pltpu.CompilerParams(
            dimension_semantics=("arbitrary",)),
    )(wT, pT, gamma.reshape(Cout, 1), beta.reshape(Cout, 1), w5_full, mask)


# ----------------------------------------------------------------------------
# Glue: transposed im2col + weight reshaping (plain XLA, small tensors only)
# ----------------------------------------------------------------------------
# TODO(synk): im2col could be folded into the kernel (grid over the 16 taps
# with a VMEM accumulator) to avoid the 4x-expanded patch matrix in HBM.
def im2col_T(x_cnhw, k, stride, pad):
    """Transposed patch matrix [K, M]; K ordered (kh, kw, Cin), M = (n, ho, wo)."""
    C, N, H, W = x_cnhw.shape
    xp = jnp.pad(x_cnhw, ((0, 0), (0, 0), (pad, pad), (pad, pad)))
    Ho = (H + 2 * pad - k) // stride + 1
    Wo = (W + 2 * pad - k) // stride + 1
    taps = []
    for di in range(k):
        for dj in range(k):
            taps.append(xp[:, :, di:di + stride * Ho:stride,
                           dj:dj + stride * Wo:stride])       # [C, N, Ho, Wo]
    pT = jnp.stack(taps, axis=0).reshape(k * k * C, N * Ho * Wo)
    return pT, (N, Ho, Wo)


def wT_of(w_oihw):
    """PyTorch [Cout, Cin, kh, kw] -> [Cout, kh*kw*Cin] matching im2col_T."""
    Cout, Cin, kh, kw = w_oihw.shape
    return jnp.transpose(w_oihw, (0, 2, 3, 1)).reshape(Cout, kh * kw * Cin)


# ----------------------------------------------------------------------------
# Discriminator forward
# ----------------------------------------------------------------------------
def discriminator_forward(x_nchw, params):
    x = jnp.transpose(x_nchw, (1, 0, 2, 3))                   # -> [C, N, H, W]

    # Block 1: Conv(4,2,1) -> LeakyReLU(0.2)
    pT, (N, Ho, Wo) = im2col_T(x, 4, 2, 1)
    y = conv_lrelu(wT_of(params["w1"]), pT)                   # [C1, M]
    x = y.reshape(-1, N, Ho, Wo)

    # Blocks 2-3: Conv(4,2,1) -> BatchNorm -> LeakyReLU (fully fused)
    for i in (2, 3):
        pT, (N, Ho, Wo) = im2col_T(x, 4, 2, 1)
        y = conv_bn_lrelu(wT_of(params[f"w{i}"]), pT,
                          params[f"g{i}"], params[f"b{i}"])
        x = y.reshape(-1, N, Ho, Wo)

    # Blocks 4+5: Conv(4,2,1)->BN->LReLU and Conv(4,1,0)->Sigmoid in one kernel
    pT, (N, Ho, Wo) = im2col_T(x, 4, 2, 1)                    # Ho = Wo = 4
    assert Ho == 4 and Wo == 4 and params["w5"].shape[-1] == 4
    C4 = params["w5"].shape[1]
    w5_flat = params["w5"][0].reshape(C4, Ho * Wo)            # [C4, 16]
    w5_full = jnp.tile(w5_flat, (1, N))                       # [C4, N*16]
    mask = jnp.repeat(jnp.eye(N, dtype=jnp.float32), Ho * Wo, axis=1)  # [N, M4]
    out = conv_bn_lrelu_head(wT_of(params["w4"]), pT,
                             params["g4"], params["b4"], w5_full, mask)
    return out.reshape(N, 1, 1, 1)                            # NCHW [N,1,1,1]


# ----------------------------------------------------------------------------
# Pure-XLA reference (same math) for a numerical self-check
# ----------------------------------------------------------------------------
def reference_forward(x, params):
    dn = ("NCHW", "OIHW", "NCHW")
    prec = jax.lax.Precision.HIGHEST

    def conv(x, w, s, p):
        return jax.lax.conv_general_dilated(
            x, w, (s, s), ((p, p), (p, p)), dimension_numbers=dn,
            precision=prec)

    def bn(x, g, b):
        mean = jnp.mean(x, axis=(0, 2, 3), keepdims=True)
        var = jnp.mean(jnp.square(x - mean), axis=(0, 2, 3), keepdims=True)
        xn = (x - mean) * jax.lax.rsqrt(var + 1e-5)
        return xn * g.reshape(1, -1, 1, 1) + b.reshape(1, -1, 1, 1)

    lrelu = lambda v: jnp.where(v > 0, v, 0.2 * v)
    h = lrelu(conv(x, params["w1"], 2, 1))
    h = lrelu(bn(conv(h, params["w2"], 2, 1), params["g2"], params["b2"]))
    h = lrelu(bn(conv(h, params["w3"], 2, 1), params["g3"], params["b3"]))
    h = lrelu(bn(conv(h, params["w4"], 2, 1), params["g4"], params["b4"]))
    return jax.nn.sigmoid(conv(h, params["w5"], 1, 0))


# ----------------------------------------------------------------------------
# Deterministic parameter init (matching weights_init: conv ~ N(0, 0.02),
# BN gamma ~ N(1, 0.02), BN beta = 0) and a small example run.
# ----------------------------------------------------------------------------
if __name__ == "__main__":
    D = 8            # D_feature_map_dim
    Cimg = 3         # image_num_channels
    N = 2            # batch
    S = 64           # spatial size implied by the 5-conv DCGAN discriminator

    key = jax.random.PRNGKey(0)
    keys = jax.random.split(key, 9)
    params = {
        "w1": 0.02 * jax.random.normal(keys[0], (D, Cimg, 4, 4), jnp.float32),
        "w2": 0.02 * jax.random.normal(keys[1], (2 * D, D, 4, 4), jnp.float32),
        "w3": 0.02 * jax.random.normal(keys[2], (4 * D, 2 * D, 4, 4), jnp.float32),
        "w4": 0.02 * jax.random.normal(keys[3], (8 * D, 4 * D, 4, 4), jnp.float32),
        "w5": 0.02 * jax.random.normal(keys[4], (1, 8 * D, 4, 4), jnp.float32),
        "g2": 1.0 + 0.02 * jax.random.normal(keys[5], (2 * D,), jnp.float32),
        "b2": jnp.zeros((2 * D,), jnp.float32),
        "g3": 1.0 + 0.02 * jax.random.normal(keys[6], (4 * D,), jnp.float32),
        "b3": jnp.zeros((4 * D,), jnp.float32),
        "g4": 1.0 + 0.02 * jax.random.normal(keys[7], (8 * D,), jnp.float32),
        "b4": jnp.zeros((8 * D,), jnp.float32),
    }

    x = jax.random.normal(keys[8], (N, Cimg, S, S), jnp.float32)

    out = jax.jit(discriminator_forward)(x, params)
    jax.block_until_ready(out)

    ref = jax.jit(reference_forward)(x, params)
    jax.block_until_ready(ref)

    assert out.shape == (N, 1, 1, 1), out.shape
    assert bool(jnp.all((out >= 0.0) & (out <= 1.0)))
    assert bool(jnp.allclose(out, ref, atol=1e-3, rtol=1e-3))
    print("KERNEL_OK")
</pallas_src>

<mosaic_0001>
module attributes {stable_mosaic.version = 11 : i64} {
  func.func @_conv_lrelu_kernel(%arg0: i32, %arg1: memref<8x48xf32, #tpu.memory_space<vmem>>, %arg2: memref<48x1024xf32, #tpu.memory_space<vmem>>, %arg3: memref<8x1024xf32, #tpu.memory_space<vmem>>) attributes {dimension_semantics = [#tpu.dimension_semantics<parallel>], iteration_bounds = array<i64: 2>, scalar_prefetch = 0 : i64, scratch_operands = 0 : i64, tpu.core_type = #tpu.core_type<tc>, window_params = [{pipeline_mode = #tpu.pipeline_mode<synchronous>, transform_indices = @transform_0, window_bounds = array<i64: 8, 48>}, {transform_indices = @transform_1, window_bounds = array<i64: 48, 1024>}, {transform_indices = @transform_2, window_bounds = array<i64: 8, 1024>}]} {
    %c0 = arith.constant 0 : index
    %c0_0 = arith.constant 0 : index
    %0 = vector.load %arg1[%c0, %c0_0] : memref<8x48xf32, #tpu.memory_space<vmem>>, vector<8x48xf32>
    %c0_1 = arith.constant 0 : index
    %c0_2 = arith.constant 0 : index
    %1 = vector.load %arg2[%c0_1, %c0_2] : memref<48x1024xf32, #tpu.memory_space<vmem>>, vector<48x1024xf32>
    %cst = arith.constant dense<0.000000e+00> : vector<8x1024xf32>
    %2 = tpu.matmul %0, %1, %cst {dimension_numbers = #tpu.dot_dimension_numbers<[1], [0], [0], [1], [0, 0, 1, 1], [], []>} : vector<8x48xf32>, vector<48x1024xf32>, vector<8x1024xf32> -> vector<8x1024xf32>
    %cst_3 = arith.constant 0.000000e+00 : f32
    %3 = vector.broadcast %cst_3 : f32 to vector<8x1024xf32>
    %4 = arith.cmpf ogt, %2, %3 : vector<8x1024xf32>
    %cst_4 = arith.constant 2.000000e-01 : f32
    %5 = vector.broadcast %cst_4 : f32 to vector<8x1024xf32>
    %6 = arith.mulf %5, %2 : vector<8x1024xf32>
    %7 = arith.select %4, %2, %6 : vector<8x1024xi1>, vector<8x1024xf32>
    %c0_5 = arith.constant 0 : index
    %c0_6 = arith.constant 0 : index
    %8 = vector.load %arg3[%c0_5, %c0_6] : memref<8x1024xf32, #tpu.memory_space<vmem>>, vector<8x1024xf32>
    tpu.vector_store %arg3[%c0_5, %c0_6], %7 {strides = array<i32>} : memref<8x1024xf32, #tpu.memory_space<vmem>>, vector<8x1024xf32>,
    return
  }
  func.func @transform_0(%arg0: i32) -> (i32, i32) {
    %c0_i32 = arith.constant 0 : i32
    %c0_i32_0 = arith.constant 0 : i32
    %c0_i32_1 = arith.constant 0 : i32
    return %c0_i32, %c0_i32_0 : i32, i32
  }
  func.func @transform_1(%arg0: i32) -> (i32, i32) {
    %c0_i32 = arith.constant 0 : i32
    %c0_i32_0 = arith.constant 0 : i32
    return %c0_i32, %arg0 : i32, i32
  }
  func.func @transform_2(%arg0: i32) -> (i32, i32) {
    %c0_i32 = arith.constant 0 : i32
    %c0_i32_0 = arith.constant 0 : i32
    return %c0_i32, %arg0 : i32, i32
  }
}

module attributes {stable_mosaic.version = 11 : i64} {
  func.func @_conv_bn_lrelu_kernel(%arg0: i32, %arg1: memref<16x128xf32, #tpu.memory_space<vmem>>, %arg2: memref<128x512xf32, #tpu.memory_space<vmem>>, %arg3: memref<16x1xf32, #tpu.memory_space<vmem>>, %arg4: memref<16x1xf32, #tpu.memory_space<vmem>>, %arg5: memref<16x512xf32, #tpu.memory_space<vmem>>) attributes {dimension_semantics = [#tpu.dimension_semantics<arbitrary>], iteration_bounds = array<i64: 1>, scalar_prefetch = 0 : i64, scratch_operands = 0 : i64, tpu.core_type = #tpu.core_type<tc>, window_params = [{pipeline_mode = #tpu.pipeline_mode<synchronous>, transform_indices = @transform_0, window_bounds = array<i64: 16, 128>}, {pipeline_mode = #tpu.pipeline_mode<synchronous>, transform_indices = @transform_1, window_bounds = array<i64: 128, 512>}, {pipeline_mode = #tpu.pipeline_mode<synchronous>, transform_indices = @transform_2, window_bounds = array<i64: 16, 1>}, {pipeline_mode = #tpu.pipeline_mode<synchronous>, transform_indices = @transform_3, window_bounds = array<i64: 16, 1>}, {pipeline_mode = #tpu.pipeline_mode<synchronous>, transform_indices = @transform_4, window_bounds = array<i64: 16, 512>}]} {
    %c0 = arith.constant 0 : index
    %c0_0 = arith.constant 0 : index
    %0 = vector.load %arg1[%c0, %c0_0] : memref<16x128xf32, #tpu.memory_space<vmem>>, vector<16x128xf32>
    %c0_1 = arith.constant 0 : index
    %c0_2 = arith.constant 0 : index
    %1 = vector.load %arg2[%c0_1, %c0_2] : memref<128x512xf32, #tpu.memory_space<vmem>>, vector<128x512xf32>
    %cst = arith.constant dense<0.000000e+00> : vector<16x512xf32>
    %2 = tpu.matmul %0, %1, %cst {dimension_numbers = #tpu.dot_dimension_numbers<[1], [0], [0], [1], [0, 0, 1, 1], [], []>} : vector<16x128xf32>, vector<128x512xf32>, vector<16x512xf32> -> vector<16x512xf32>
    %cst_3 = arith.constant dense<0.000000e+00> : vector<16xf32>
    %3 = vector.multi_reduction <add>, %2, %cst_3 [1] : vector<16x512xf32> to vector<16xf32>
    %4 = vector.shape_cast %3 : vector<16xf32> to vector<16x1xf32>
    %cst_4 = arith.constant 5.120000e+02 : f32
    %5 = vector.broadcast %cst_4 : f32 to vector<16x1xf32>
    %6 = arith.divf %4, %5 : vector<16x1xf32>
    %7 = vector.broadcast %6 : vector<16x1xf32> to vector<16x512xf32>
    %8 = arith.subf %2, %7 : vector<16x512xf32>
    %9 = arith.mulf %8, %8 : vector<16x512xf32>
    %cst_5 = arith.constant dense<0.000000e+00> : vector<16xf32>
    %10 = vector.multi_reduction <add>, %9, %cst_5 [1] : vector<16x512xf32> to vector<16xf32>
    %11 = vector.shape_cast %10 : vector<16xf32> to vector<16x1xf32>
    %cst_6 = arith.constant 5.120000e+02 : f32
    %12 = vector.broadcast %cst_6 : f32 to vector<16x1xf32>
    %13 = arith.divf %11, %12 : vector<16x1xf32>
    %14 = vector.broadcast %6 : vector<16x1xf32> to vector<16x512xf32>
    %15 = arith.subf %2, %14 : vector<16x512xf32>
    %cst_7 = arith.constant 9.99999974E-6 : f32
    %16 = vector.broadcast %cst_7 : f32 to vector<16x1xf32>
    %17 = arith.addf %13, %16 : vector<16x1xf32>
    %18 = math.rsqrt %17 : vector<16x1xf32>
    %19 = vector.broadcast %18 : vector<16x1xf32> to vector<16x512xf32>
    %20 = arith.mulf %15, %19 : vector<16x512xf32>
    %c0_8 = arith.constant 0 : index
    %c0_9 = arith.constant 0 : index
    %21 = vector.load %arg3[%c0_8, %c0_9] : memref<16x1xf32, #tpu.memory_space<vmem>>, vector<16x1xf32>
    %22 = vector.broadcast %21 : vector<16x1xf32> to vector<16x512xf32>
    %23 = arith.mulf %20, %22 : vector<16x512xf32>
    %c0_10 = arith.constant 0 : index
    %c0_11 = arith.constant 0 : index
    %24 = vector.load %arg4[%c0_10, %c0_11] : memref<16x1xf32, #tpu.memory_space<vmem>>, vector<16x1xf32>
    %25 = vector.broadcast %24 : vector<16x1xf32> to vector<16x512xf32>
    %26 = arith.addf %23, %25 : vector<16x512xf32>
    %cst_12 = arith.constant 0.000000e+00 : f32
    %27 = vector.broadcast %cst_12 : f32 to vector<16x512xf32>
    %28 = arith.cmpf ogt, %26, %27 : vector<16x512xf32>
    %cst_13 = arith.constant 2.000000e-01 : f32
    %29 = vector.broadcast %cst_13 : f32 to vector<16x512xf32>
    %30 = arith.mulf %29, %26 : vector<16x512xf32>
    %31 = arith.select %28, %26, %30 : vector<16x512xi1>, vector<16x512xf32>
    %c0_14 = arith.constant 0 : index
    %c0_15 = arith.constant 0 : index
    %32 = vector.load %arg5[%c0_14, %c0_15] : memref<16x512xf32, #tpu.memory_space<vmem>>, vector<16x512xf32>
    tpu.vector_store %arg5[%c0_14, %c0_15], %31 {strides = array<i32>} : memref<16x512xf32, #tpu.memory_space<vmem>>, vector<16x512xf32>,
    return
  }
  func.func @transform_0(%arg0: i32) -> (i32, i32) {
    %c0_i32 = arith.constant 0 : i32
    %c0_i32_0 = arith.constant 0 : i32
    %c0_i32_1 = arith.constant 0 : i32
    return %c0_i32, %c0_i32_0 : i32, i32
  }
  func.func @transform_1(%arg0: i32) -> (i32, i32) {
    %c0_i32 = arith.constant 0 : i32
    %c0_i32_0 = arith.constant 0 : i32
    %c0_i32_1 = arith.constant 0 : i32
    return %c0_i32, %c0_i32_0 : i32, i32
  }
  func.func @transform_2(%arg0: i32) -> (i32, i32) {
    %c0_i32 = arith.constant 0 : i32
    %c0_i32_0 = arith.constant 0 : i32
    %c0_i32_1 = arith.constant 0 : i32
    return %c0_i32, %c0_i32_0 : i32, i32
  }
  func.func @transform_3(%arg0: i32) -> (i32, i32) {
    %c0_i32 = arith.constant 0 : i32
    %c0_i32_0 = arith.constant 0 : i32
    %c0_i32_1 = arith.constant 0 : i32
    return %c0_i32, %c0_i32_0 : i32, i32
  }
  func.func @transform_4(%arg0: i32) -> (i32, i32) {
    %c0_i32 = arith.constant 0 : i32
    %c0_i32_0 = arith.constant 0 : i32
    %c0_i32_1 = arith.constant 0 : i32
    return %c0_i32, %c0_i32_0 : i32, i32
  }
}

module attributes {stable_mosaic.version = 11 : i64} {
  func.func @_conv_bn_lrelu_kernel(%arg0: i32, %arg1: memref<32x256xf32, #tpu.memory_space<vmem>>, %arg2: memref<256x128xf32, #tpu.memory_space<vmem>>, %arg3: memref<32x1xf32, #tpu.memory_space<vmem>>, %arg4: memref<32x1xf32, #tpu.memory_space<vmem>>, %arg5: memref<32x128xf32, #tpu.memory_space<vmem>>) attributes {dimension_semantics = [#tpu.dimension_semantics<arbitrary>], iteration_bounds = array<i64: 1>, scalar_prefetch = 0 : i64, scratch_operands = 0 : i64, tpu.core_type = #tpu.core_type<tc>, window_params = [{pipeline_mode = #tpu.pipeline_mode<synchronous>, transform_indices = @transform_0, window_bounds = array<i64: 32, 256>}, {pipeline_mode = #tpu.pipeline_mode<synchronous>, transform_indices = @transform_1, window_bounds = array<i64: 256, 128>}, {pipeline_mode = #tpu.pipeline_mode<synchronous>, transform_indices = @transform_2, window_bounds = array<i64: 32, 1>}, {pipeline_mode = #tpu.pipeline_mode<synchronous>, transform_indices = @transform_3, window_bounds = array<i64: 32, 1>}, {pipeline_mode = #tpu.pipeline_mode<synchronous>, transform_indices = @transform_4, window_bounds = array<i64: 32, 128>}]} {
    %c0 = arith.constant 0 : index
    %c0_0 = arith.constant 0 : index
    %0 = vector.load %arg1[%c0, %c0_0] : memref<32x256xf32, #tpu.memory_space<vmem>>, vector<32x256xf32>
    %c0_1 = arith.constant 0 : index
    %c0_2 = arith.constant 0 : index
    %1 = vector.load %arg2[%c0_1, %c0_2] : memref<256x128xf32, #tpu.memory_space<vmem>>, vector<256x128xf32>
    %cst = arith.constant dense<0.000000e+00> : vector<32x128xf32>
    %2 = tpu.matmul %0, %1, %cst {dimension_numbers = #tpu.dot_dimension_numbers<[1], [0], [0], [1], [0, 0, 1, 1], [], []>} : vector<32x256xf32>, vector<256x128xf32>, vector<32x128xf32> -> vector<32x128xf32>
    %cst_3 = arith.constant dense<0.000000e+00> : vector<32xf32>
    %3 = vector.multi_reduction <add>, %2, %cst_3 [1] : vector<32x128xf32> to vector<32xf32>
    %4 = vector.shape_cast %3 : vector<32xf32> to vector<32x1xf32>
    %cst_4 = arith.constant 1.280000e+02 : f32
    %5 = vector.broadcast %cst_4 : f32 to vector<32x1xf32>
    %6 = arith.divf %4, %5 : vector<32x1xf32>
    %7 = vector.broadcast %6 : vector<32x1xf32> to vector<32x128xf32>
    %8 = arith.subf %2, %7 : vector<32x128xf32>
    %9 = arith.mulf %8, %8 : vector<32x128xf32>
    %cst_5 = arith.constant dense<0.000000e+00> : vector<32xf32>
    %10 = vector.multi_reduction <add>, %9, %cst_5 [1] : vector<32x128xf32> to vector<32xf32>
    %11 = vector.shape_cast %10 : vector<32xf32> to vector<32x1xf32>
    %cst_6 = arith.constant 1.280000e+02 : f32
    %12 = vector.broadcast %cst_6 : f32 to vector<32x1xf32>
    %13 = arith.divf %11, %12 : vector<32x1xf32>
    %14 = vector.broadcast %6 : vector<32x1xf32> to vector<32x128xf32>
    %15 = arith.subf %2, %14 : vector<32x128xf32>
    %cst_7 = arith.constant 9.99999974E-6 : f32
    %16 = vector.broadcast %cst_7 : f32 to vector<32x1xf32>
    %17 = arith.addf %13, %16 : vector<32x1xf32>
    %18 = math.rsqrt %17 : vector<32x1xf32>
    %19 = vector.broadcast %18 : vector<32x1xf32> to vector<32x128xf32>
    %20 = arith.mulf %15, %19 : vector<32x128xf32>
    %c0_8 = arith.constant 0 : index
    %c0_9 = arith.constant 0 : index
    %21 = vector.load %arg3[%c0_8, %c0_9] : memref<32x1xf32, #tpu.memory_space<vmem>>, vector<32x1xf32>
    %22 = vector.broadcast %21 : vector<32x1xf32> to vector<32x128xf32>
    %23 = arith.mulf %20, %22 : vector<32x128xf32>
    %c0_10 = arith.constant 0 : index
    %c0_11 = arith.constant 0 : index
    %24 = vector.load %arg4[%c0_10, %c0_11] : memref<32x1xf32, #tpu.memory_space<vmem>>, vector<32x1xf32>
    %25 = vector.broadcast %24 : vector<32x1xf32> to vector<32x128xf32>
    %26 = arith.addf %23, %25 : vector<32x128xf32>
    %cst_12 = arith.constant 0.000000e+00 : f32
    %27 = vector.broadcast %cst_12 : f32 to vector<32x128xf32>
    %28 = arith.cmpf ogt, %26, %27 : vector<32x128xf32>
    %cst_13 = arith.constant 2.000000e-01 : f32
    %29 = vector.broadcast %cst_13 : f32 to vector<32x128xf32>
    %30 = arith.mulf %29, %26 : vector<32x128xf32>
    %31 = arith.select %28, %26, %30 : vector<32x128xi1>, vector<32x128xf32>
    %c0_14 = arith.constant 0 : index
    %c0_15 = arith.constant 0 : index
    %32 = vector.load %arg5[%c0_14, %c0_15] : memref<32x128xf32, #tpu.memory_space<vmem>>, vector<32x128xf32>
    tpu.vector_store %arg5[%c0_14, %c0_15], %31 {strides = array<i32>} : memref<32x128xf32, #tpu.memory_space<vmem>>, vector<32x128xf32>,
    return
  }
  func.func @transform_0(%arg0: i32) -> (i32, i32) {
    %c0_i32 = arith.constant 0 : i32
    %c0_i32_0 = arith.constant 0 : i32
    %c0_i32_1 = arith.constant 0 : i32
    return %c0_i32, %c0_i32_0 : i32, i32
  }
  func.func @transform_1(%arg0: i32) -> (i32, i32) {
    %c0_i32 = arith.constant 0 : i32
    %c0_i32_0 = arith.constant 0 : i32
    %c0_i32_1 = arith.constant 0 : i32
    return %c0_i32, %c0_i32_0 : i32, i32
  }
  func.func @transform_2(%arg0: i32) -> (i32, i32) {
    %c0_i32 = arith.constant 0 : i32
    %c0_i32_0 = arith.constant 0 : i32
    %c0_i32_1 = arith.constant 0 : i32
    return %c0_i32, %c0_i32_0 : i32, i32
  }
  func.func @transform_3(%arg0: i32) -> (i32, i32) {
    %c0_i32 = arith.constant 0 : i32
    %c0_i32_0 = arith.constant 0 : i32
    %c0_i32_1 = arith.constant 0 : i32
    return %c0_i32, %c0_i32_0 : i32, i32
  }
  func.func @transform_4(%arg0: i32) -> (i32, i32) {
    %c0_i32 = arith.constant 0 : i32
    %c0_i32_0 = arith.constant 0 : i32
    %c0_i32_1 = arith.constant 0 : i32
    return %c0_i32, %c0_i32_0 : i32, i32
  }
}

module attributes {stable_mosaic.version = 11 : i64} {
  func.func @_conv_bn_lrelu_head_kernel(%arg0: i32, %arg1: memref<64x512xf32, #tpu.memory_space<vmem>>, %arg2: memref<512x32xf32, #tpu.memory_space<vmem>>, %arg3: memref<64x1xf32, #tpu.memory_space<vmem>>, %arg4: memref<64x1xf32, #tpu.memory_space<vmem>>, %arg5: memref<64x32xf32, #tpu.memory_space<vmem>>, %arg6: memref<2x32xf32, #tpu.memory_space<vmem>>, %arg7: memref<2x1xf32, #tpu.memory_space<vmem>>) attributes {dimension_semantics = [#tpu.dimension_semantics<arbitrary>], iteration_bounds = array<i64: 1>, scalar_prefetch = 0 : i64, scratch_operands = 0 : i64, tpu.core_type = #tpu.core_type<tc>, window_params = [{pipeline_mode = #tpu.pipeline_mode<synchronous>, transform_indices = @transform_0, window_bounds = array<i64: 64, 512>}, {pipeline_mode = #tpu.pipeline_mode<synchronous>, transform_indices = @transform_1, window_bounds = array<i64: 512, 32>}, {pipeline_mode = #tpu.pipeline_mode<synchronous>, transform_indices = @transform_2, window_bounds = array<i64: 64, 1>}, {pipeline_mode = #tpu.pipeline_mode<synchronous>, transform_indices = @transform_3, window_bounds = array<i64: 64, 1>}, {pipeline_mode = #tpu.pipeline_mode<synchronous>, transform_indices = @transform_4, window_bounds = array<i64: 64, 32>}, {pipeline_mode = #tpu.pipeline_mode<synchronous>, transform_indices = @transform_5, window_bounds = array<i64: 2, 32>}, {pipeline_mode = #tpu.pipeline_mode<synchronous>, transform_indices = @transform_6, window_bounds = array<i64: 2, 1>}]} {
    %c0 = arith.constant 0 : index
    %c0_0 = arith.constant 0 : index
    %0 = vector.load %arg1[%c0, %c0_0] : memref<64x512xf32, #tpu.memory_space<vmem>>, vector<64x512xf32>
    %c0_1 = arith.constant 0 : index
    %c0_2 = arith.constant 0 : index
    %1 = vector.load %arg2[%c0_1, %c0_2] : memref<512x32xf32, #tpu.memory_space<vmem>>, vector<512x32xf32>
    %cst = arith.constant dense<0.000000e+00> : vector<64x32xf32>
    %2 = tpu.matmul %0, %1, %cst {dimension_numbers = #tpu.dot_dimension_numbers<[1], [0], [0], [1], [0, 0, 1, 1], [], []>} : vector<64x512xf32>, vector<512x32xf32>, vector<64x32xf32> -> vector<64x32xf32>
    %cst_3 = arith.constant dense<0.000000e+00> : vector<64xf32>
    %3 = vector.multi_reduction <add>, %2, %cst_3 [1] : vector<64x32xf32> to vector<64xf32>
    %4 = vector.shape_cast %3 : vector<64xf32> to vector<64x1xf32>
    %cst_4 = arith.constant 3.200000e+01 : f32
    %5 = vector.broadcast %cst_4 : f32 to vector<64x1xf32>
    %6 = arith.divf %4, %5 : vector<64x1xf32>
    %7 = vector.broadcast %6 : vector<64x1xf32> to vector<64x32xf32>
    %8 = arith.subf %2, %7 : vector<64x32xf32>
    %9 = arith.mulf %8, %8 : vector<64x32xf32>
    %cst_5 = arith.constant dense<0.000000e+00> : vector<64xf32>
    %10 = vector.multi_reduction <add>, %9, %cst_5 [1] : vector<64x32xf32> to vector<64xf32>
    %11 = vector.shape_cast %10 : vector<64xf32> to vector<64x1xf32>
    %cst_6 = arith.constant 3.200000e+01 : f32
    %12 = vector.broadcast %cst_6 : f32 to vector<64x1xf32>
    %13 = arith.divf %11, %12 : vector<64x1xf32>
    %14 = vector.broadcast %6 : vector<64x1xf32> to vector<64x32xf32>
    %15 = arith.subf %2, %14 : vector<64x32xf32>
    %cst_7 = arith.constant 9.99999974E-6 : f32
    %16 = vector.broadcast %cst_7 : f32 to vector<64x1xf32>
    %17 = arith.addf %13, %16 : vector<64x1xf32>
    %18 = math.rsqrt %17 : vector<64x1xf32>
    %19 = vector.broadcast %18 : vector<64x1xf32> to vector<64x32xf32>
    %20 = arith.mulf %15, %19 : vector<64x32xf32>
    %c0_8 = arith.constant 0 : index
    %c0_9 = arith.constant 0 : index
    %21 = vector.load %arg3[%c0_8, %c0_9] : memref<64x1xf32, #tpu.memory_space<vmem>>, vector<64x1xf32>
    %22 = vector.broadcast %21 : vector<64x1xf32> to vector<64x32xf32>
    %23 = arith.mulf %20, %22 : vector<64x32xf32>
    %c0_10 = arith.constant 0 : index
    %c0_11 = arith.constant 0 : index
    %24 = vector.load %arg4[%c0_10, %c0_11] : memref<64x1xf32, #tpu.memory_space<vmem>>, vector<64x1xf32>
    %25 = vector.broadcast %24 : vector<64x1xf32> to vector<64x32xf32>
    %26 = arith.addf %23, %25 : vector<64x32xf32>
    %cst_12 = arith.constant 0.000000e+00 : f32
    %27 = vector.broadcast %cst_12 : f32 to vector<64x32xf32>
    %28 = arith.cmpf ogt, %26, %27 : vector<64x32xf32>
    %cst_13 = arith.constant 2.000000e-01 : f32
    %29 = vector.broadcast %cst_13 : f32 to vector<64x32xf32>
    %30 = arith.mulf %29, %26 : vector<64x32xf32>
    %31 = arith.select %28, %26, %30 : vector<64x32xi1>, vector<64x32xf32>
    %c0_14 = arith.constant 0 : index
    %c0_15 = arith.constant 0 : index
    %32 = vector.load %arg5[%c0_14, %c0_15] : memref<64x32xf32, #tpu.memory_space<vmem>>, vector<64x32xf32>
    %33 = arith.mulf %31, %32 : vector<64x32xf32>
    %cst_16 = arith.constant dense<0.000000e+00> : vector<32xf32>
    %34 = vector.multi_reduction <add>, %33, %cst_16 [0] : vector<64x32xf32> to vector<32xf32>
    %35 = vector.shape_cast %34 : vector<32xf32> to vector<1x32xf32>
    %c0_17 = arith.constant 0 : index
    %c0_18 = arith.constant 0 : index
    %36 = vector.load %arg6[%c0_17, %c0_18] : memref<2x32xf32, #tpu.memory_space<vmem>>, vector<2x32xf32>
    %37 = vector.broadcast %35 : vector<1x32xf32> to vector<2x32xf32>
    %38 = arith.mulf %36, %37 : vector<2x32xf32>
    %cst_19 = arith.constant dense<0.000000e+00> : vector<2xf32>
    %39 = vector.multi_reduction <add>, %38, %cst_19 [1] : vector<2x32xf32> to vector<2xf32>
    %40 = vector.shape_cast %39 : vector<2xf32> to vector<2x1xf32>
    %cst_20 = arith.constant 0.000000e+00 : f32
    %41 = vector.broadcast %cst_20 : f32 to vector<2x1xf32>
    %42 = arith.subf %41, %40 : vector<2x1xf32>
    %43 = math.exp %42 : vector<2x1xf32>
    %cst_21 = arith.constant 1.000000e+00 : f32
    %44 = vector.broadcast %cst_21 : f32 to vector<2x1xf32>
    %45 = arith.addf %44, %43 : vector<2x1xf32>
    %cst_22 = arith.constant 1.000000e+00 : f32
    %46 = vector.broadcast %cst_22 : f32 to vector<2x1xf32>
    %47 = arith.divf %46, %45 : vector<2x1xf32>
    %c0_23 = arith.constant 0 : index
    %c0_24 = arith.constant 0 : index
    %48 = vector.load %arg7[%c0_23, %c0_24] : memref<2x1xf32, #tpu.memory_space<vmem>>, vector<2x1xf32>
    tpu.vector_store %arg7[%c0_23, %c0_24], %47 {strides = array<i32>} : memref<2x1xf32, #tpu.memory_space<vmem>>, vector<2x1xf32>,
    return
  }
  func.func @transform_0(%arg0: i32) -> (i32, i32) {
    %c0_i32 = arith.constant 0 : i32
    %c0_i32_0 = arith.constant 0 : i32
    %c0_i32_1 = arith.constant 0 : i32
    return %c0_i32, %c0_i32_0 : i32, i32
  }
  func.func @transform_1(%arg0: i32) -> (i32, i32) {
    %c0_i32 = arith.constant 0 : i32
    %c0_i32_0 = arith.constant 0 : i32
    %c0_i32_1 = arith.constant 0 : i32
    return %c0_i32, %c0_i32_0 : i32, i32
  }
  func.func @transform_2(%arg0: i32) -> (i32, i32) {
    %c0_i32 = arith.constant 0 : i32
    %c0_i32_0 = arith.constant 0 : i32
    %c0_i32_1 = arith.constant 0 : i32
    return %c0_i32, %c0_i32_0 : i32, i32
  }
  func.func @transform_3(%arg0: i32) -> (i32, i32) {
    %c0_i32 = arith.constant 0 : i32
    %c0_i32_0 = arith.constant 0 : i32
    %c0_i32_1 = arith.constant 0 : i32
    return %c0_i32, %c0_i32_0 : i32, i32
  }
  func.func @transform_4(%arg0: i32) -> (i32, i32) {
    %c0_i32 = arith.constant 0 : i32
    %c0_i32_0 = arith.constant 0 : i32
    %c0_i32_1 = arith.constant 0 : i32
    return %c0_i32, %c0_i32_0 : i32, i32
  }
  func.func @transform_5(%arg0: i32) -> (i32, i32) {
    %c0_i32 = arith.constant 0 : i32
    %c0_i32_0 = arith.constant 0 : i32
    %c0_i32_1 = arith.constant 0 : i32
    return %c0_i32, %c0_i32_0 : i32, i32
  }
  func.func @transform_6(%arg0: i32) -> (i32, i32) {
    %c0_i32 = arith.constant 0 : i32
    %c0_i32_0 = arith.constant 0 : i32
    %c0_i32_1 = arith.constant 0 : i32
    return %c0_i32, %c0_i32_0 : i32, i32
  }
}

</mosaic_0001>

<bundles_post_ra>
// kernel: discriminator_forward.4
= control target key start
LH: loop header
LB: loop body
LE: loop exit
PB: predicated region body
PF: predicated region fallthrough
CT: control target
= control target key end

     0   :  { %s822_s9 = smov 0   ;;  %s824_s10 = smov 0   ;;  %s1045_s0 = inlined_call_operand.vmem [shape: f32[8,48], index: 0, kind: input, shape index: {}]   ;;  %s1046_s1 = inlined_call_operand.vmem [shape: f32[48,2048], index: 1, kind: input, shape index: {}]   ;;  %s1047_s2 = inlined_call_operand.vmem [shape: f32[8,2048], index: 2, kind: output, shape index: {}]  }
   0x1   :  { %s826_s11 = smov 0  }
   0x2 LB: > { %s691_s12 = sadd.s32 4294967295, %s804_s11   ;;  %s839_s13 = sadd.s32 1, %s804_s11   ;;  %s804_s11 = sphi %s826_s11, %s1050_s11   ;;  %s800_s10 = sphi %s824_s10, %s1049_s10   ;;  %s796_s9 = sphi %s822_s9, %s1048_s9  }
   0x3   : > { %s37_s14 = ssub.s32 %s804_s11, %s839_s13  ;;  %s40_s15 = sadd.s32 1, %s800_s10 }
   0x4   : > { %p38_p0 = scmp.eq.s32.totalorder %s37_s14, 0  ;;  %p47_p1 = scmp.ne.s32.totalorder %s800_s10, %s796_s9 }
   0x5   : > { %p48_p2 = scmp.eq.s32.totalorder %s804_s11, 0  ;;  %p694_p4 = scmp.ge.s32.totalorder %s804_s11, 2 }
   0x6   : > { %s848_s16 = scalar_select %p38_p0, %s800_s10, %s40_s15  }
   0x7   : > { %p49_p3 = por %p48_p2, %p47_p1  ;;  %102 = sbr.rel (%p694_p4) target bundleno = 43 (0x2b), region = 20 }
   0xe   : > { %105 = sbr.rel (!%p49_p3) target bundleno = 43 (0x2b), region = 24  ;;  %s107_s17 = sand.u32 (%p49_p3), 1, %s800_s10  }
   0xf   : > { %s706_s18 = sshll.u32 (%p49_p3), %s804_s11, 6  ;;  %s755_s19 = smul.u32 (%p49_p3), 384, %s107_s17 }
  0x10   : > { %s856_s22 = scalar_lea.vmem (%p49_p3), %s1046_s1, %s706_s18 }
  0x11   : > { %v125_v0 = vld [vmem:[%s856_s22] sm:$0xff] (%p49_p3)  ;;  %v127_v1 = vld [vmem:[%s856_s22 + $0x8] sm:$0xff] (%p49_p3)  ;;  %v129_v2 = vld [vmem:[%s856_s22 + $0x10] sm:$0xff] (%p49_p3)  ;;  %s864_s23 = scalar_lea.vmem (%p49_p3), [#allocation2], %s755_s19 }
  0x12   : > { %v131_v3 = vld [vmem:[%s856_s22 + $0x18] sm:$0xff] (%p49_p3)  ;;  %v133_v4 = vld [vmem:[%s856_s22 + $0x20] sm:$0xff] (%p49_p3)  ;;  %v135_v5 = vld [vmem:[%s856_s22 + $0x28] sm:$0xff] (%p49_p3)  ;;  %126 = vst [vmem:[%s864_s23] sm:$0xff] (%p49_p3), %v125_v0 }
  0x13   : > { %128 = vst [vmem:[%s864_s23 + $0x8] sm:$0xff] (%p49_p3), %v127_v1  ;;  %130 = vst [vmem:[%s864_s23 + $0x10] sm:$0xff] (%p49_p3), %v129_v2  ;;  %v137_v6 = vld [vmem:[%s856_s22 + $0x30] sm:$0xff] (%p49_p3)  ;;  %v139_v7 = vld [vmem:[%s856_s22 + $0x38] sm:$0xff] (%p49_p3) }
  0x14   : > { %132 = vst [vmem:[%s864_s23 + $0x18] sm:$0xff] (%p49_p3), %v131_v3  ;;  %134 = vst [vmem:[%s864_s23 + $0x20] sm:$0xff] (%p49_p3), %v133_v4  ;;  %v141_v8 = vld [vmem:[%s856_s22 + $0x80] sm:$0xff] (%p49_p3)  ;;  %v143_v9 = vld [vmem:[%s856_s22 + $0x88] sm:$0xff] (%p49_p3) }
  0x15   : > { %136 = vst [vmem:[%s864_s23 + $0x28] sm:$0xff] %v135_v5  ;;  %138 = vst [vmem:[%s864_s23 + $0x30] sm:$0xff] %v137_v6  ;;  %v145_v10 = vld [vmem:[%s856_s22 + $0x90] sm:$0xff]  ;;  %v147_v11 = vld [vmem:[%s856_s22 + $0x98] sm:$0xff] }
  0x16   : > { %140 = vst [vmem:[%s864_s23 + $0x38] sm:$0xff] %v139_v7  ;;  %142 = vst [vmem:[%s864_s23 + $0x40] sm:$0xff] %v141_v8  ;;  %v149_v12 = vld [vmem:[%s856_s22 + $0xa0] sm:$0xff]  ;;  %v151_v13 = vld [vmem:[%s856_s22 + $0xa8] sm:$0xff] }
  0x17   : > { %144 = vst [vmem:[%s864_s23 + $0x48] sm:$0xff] %v143_v9  ;;  %146 = vst [vmem:[%s864_s23 + $0x50] sm:$0xff] %v145_v10  ;;  %v153_v14 = vld [vmem:[%s856_s22 + $0xb0] sm:$0xff]  ;;  %v155_v15 = vld [vmem:[%s856_s22 + $0xb8] sm:$0xff] }
  0x18   : > { %148 = vst [vmem:[%s864_s23 + $0x58] sm:$0xff] %v147_v11  ;;  %150 = vst [vmem:[%s864_s23 + $0x60] sm:$0xff] %v149_v12  ;;  %v157_v16 = vld [vmem:[%s856_s22 + $0x100] sm:$0xff]  ;;  %v159_v17 = vld [vmem:[%s856_s22 + $0x108] sm:$0xff] }
  0x19   : > { %152 = vst [vmem:[%s864_s23 + $0x68] sm:$0xff] %v151_v13  ;;  %154 = vst [vmem:[%s864_s23 + $0x70] sm:$0xff] %v153_v14  ;;  %v161_v18 = vld [vmem:[%s856_s22 + $0x110] sm:$0xff]  ;;  %v163_v19 = vld [vmem:[%s856_s22 + $0x118] sm:$0xff] }
  0x1a   : > { %156 = vst [vmem:[%s864_s23 + $0x78] sm:$0xff] %v155_v15  ;;  %158 = vst [vmem:[%s864_s23 + $0x80] sm:$0xff] %v157_v16  ;;  %v165_v20 = vld [vmem:[%s856_s22 + $0x120] sm:$0xff]  ;;  %v167_v21 = vld [vmem:[%s856_s22 + $0x128] sm:$0xff] }
  0x1b   : > { %160 = vst [vmem:[%s864_s23 + $0x88] sm:$0xff] %v159_v17  ;;  %162 = vst [vmem:[%s864_s23 + $0x90] sm:$0xff] %v161_v18  ;;  %v169_v22 = vld [vmem:[%s856_s22 + $0x130] sm:$0xff]  ;;  %v171_v23 = vld [vmem:[%s856_s22 + $0x138] sm:$0xff] }
  0x1c   : > { %164 = vst [vmem:[%s864_s23 + $0x98] sm:$0xff] %v163_v19  ;;  %166 = vst [vmem:[%s864_s23 + $0xa0] sm:$0xff] %v165_v20  ;;  %v173_v24 = vld [vmem:[%s856_s22 + $0x180] sm:$0xff]  ;;  %v175_v25 = vld [vmem:[%s856_s22 + $0x188] sm:$0xff] }
  0x1d   : > { %168 = vst [vmem:[%s864_s23 + $0xa8] sm:$0xff] %v167_v21  ;;  %170 = vst [vmem:[%s864_s23 + $0xb0] sm:$0xff] %v169_v22  ;;  %v177_v26 = vld [vmem:[%s856_s22 + $0x190] sm:$0xff]  ;;  %v179_v27 = vld [vmem:[%s856_s22 + $0x198] sm:$0xff] }
  0x1e   : > { %172 = vst [vmem:[%s864_s23 + $0xb8] sm:$0xff] %v171_v23  ;;  %174 = vst [vmem:[%s864_s23 + $0xc0] sm:$0xff] %v173_v24  ;;  %v181_v28 = vld [vmem:[%s856_s22 + $0x1a0] sm:$0xff]  ;;  %v183_v29 = vld [vmem:[%s856_s22 + $0x1a8] sm:$0xff] }
  0x1f   : > { %176 = vst [vmem:[%s864_s23 + $0xc8] sm:$0xff] %v175_v25  ;;  %178 = vst [vmem:[%s864_s23 + $0xd0] sm:$0xff] %v177_v26  ;;  %v185_v30 = vld [vmem:[%s856_s22 + $0x1b0] sm:$0xff]  ;;  %v187_v31 = vld [vmem:[%s856_s22 + $0x1b8] sm:$0xff] }
  0x20   : > { %180 = vst [vmem:[%s864_s23 + $0xd8] sm:$0xff] %v179_v27  ;;  %182 = vst [vmem:[%s864_s23 + $0xe0] sm:$0xff] %v181_v28  ;;  %v189_v32 = vld [vmem:[%s856_s22 + $0x200] sm:$0xff]  ;;  %v191_v33 = vld [vmem:[%s856_s22 + $0x208] sm:$0xff] }
  0x21   : > { %184 = vst [vmem:[%s864_s23 + $0xe8] sm:$0xff] %v183_v29  ;;  %186 = vst [vmem:[%s864_s23 + $0xf0] sm:$0xff] %v185_v30  ;;  %v193_v34 = vld [vmem:[%s856_s22 + $0x210] sm:$0xff]  ;;  %v195_v35 = vld [vmem:[%s856_s22 + $0x218] sm:$0xff] }
  0x22   : > { %188 = vst [vmem:[%s864_s23 + $0xf8] sm:$0xff] %v187_v31  ;;  %190 = vst [vmem:[%s864_s23 + $0x100] sm:$0xff] %v189_v32  ;;  %v197_v36 = vld [vmem:[%s856_s22 + $0x220] sm:$0xff]  ;;  %v199_v37 = vld [vmem:[%s856_s22 + $0x228] sm:$0xff] }
  0x23   : > { %192 = vst [vmem:[%s864_s23 + $0x108] sm:$0xff] %v191_v33  ;;  %194 = vst [vmem:[%s864_s23 + $0x110] sm:$0xff] %v193_v34  ;;  %v201_v38 = vld [vmem:[%s856_s22 + $0x230] sm:$0xff]  ;;  %v203_v39 = vld [vmem:[%s856_s22 + $0x238] sm:$0xff] }
  0x24   : > { %196 = vst [vmem:[%s864_s23 + $0x118] sm:$0xff] %v195_v35  ;;  %198 = vst [vmem:[%s864_s23 + $0x120] sm:$0xff] %v197_v36  ;;  %v205_v40 = vld [vmem:[%s856_s22 + $0x280] sm:$0xff]  ;;  %v207_v41 = vld [vmem:[%s856_s22 + $0x288] sm:$0xff] }
  0x25   : > { %200 = vst [vmem:[%s864_s23 + $0x128] sm:$0xff] %v199_v37  ;;  %202 = vst [vmem:[%s864_s23 + $0x130] sm:$0xff] %v201_v38  ;;  %v209_v42 = vld [vmem:[%s856_s22 + $0x290] sm:$0xff]  ;;  %v211_v43 = vld [vmem:[%s856_s22 + $0x298] sm:$0xff] }
  0x26   : > { %204 = vst [vmem:[%s864_s23 + $0x138] sm:$0xff] %v203_v39  ;;  %206 = vst [vmem:[%s864_s23 + $0x140] sm:$0xff] %v205_v40  ;;  %v213_v44 = vld [vmem:[%s856_s22 + $0x2a0] sm:$0xff]  ;;  %v215_v45 = vld [vmem:[%s856_s22 + $0x2a8] sm:$0xff] }
  0x27   : > { %208 = vst [vmem:[%s864_s23 + $0x148] sm:$0xff] %v207_v41  ;;  %210 = vst [vmem:[%s864_s23 + $0x150] sm:$0xff] %v209_v42  ;;  %v217_v46 = vld [vmem:[%s856_s22 + $0x2b0] sm:$0xff]  ;;  %v219_v47 = vld [vmem:[%s856_s22 + $0x2b8] sm:$0xff] }
  0x28   : > { %212 = vst [vmem:[%s864_s23 + $0x158] sm:$0xff] %v211_v43  ;;  %214 = vst [vmem:[%s864_s23 + $0x160] sm:$0xff] %v213_v44 }
  0x29   : > { %216 = vst [vmem:[%s864_s23 + $0x168] sm:$0xff] %v215_v45  ;;  %218 = vst [vmem:[%s864_s23 + $0x170] sm:$0xff] %v217_v46 }
  0x2a   : > { %220 = vst [vmem:[%s864_s23 + $0x178] sm:$0xff] %v219_v47 }
  0x2b PF: > { %p697_p5 = scmp.ge.s32.totalorder %s804_s11, 1  ;;  %p225_p6 = scmp.lt.s32.totalorder %s804_s11, 3 }
  0x2d   : > { %p226_p7 = pnand %p697_p5, %p225_p6 }
  0x2e   : > { %s232_s24 = sand.u32 (!%p226_p7), 1, %s796_s9   ;;  %v806_v48 = vmov (!%p226_p7), 0.0   ;;  %v260_v35 = vld [vmem:[%s1045_s0] sm:$0xff] (!%p226_p7)  ;;  %vm309_vm0 = vcmask (!%p226_p7), 392192   ;;  %s698_s29 = sshll.u32 (!%p226_p7), %s691_s12, 3 }
  0x2f   : > { %229 = sbr.rel (%p226_p7) target bundleno = 298 (0x12a), region = 47  ;;  %377 = vmatprep.mubr.f32.mxu0 (!%p226_p7), %v806_v48  ;;  %448 = vmatprep.mubr.f32.mxu1 (!%p226_p7), %v806_v48  ;;  %p255_p8 = scmp.lt.s32.totalorder (!%p226_p7), %s698_s29, 15 }
  0x30   : > { %s756_s25 = smul.u32 (!%p226_p7), 384, %s232_s24 }
  0x32   : > { %s961_s26 = scalar_lea.vmem (!%p226_p7), [#allocation2], %s756_s25 }
  0x33   : > { %v262_v49 = vld [vmem:[%s961_s26 + $0x8] sm:$0xff] (!%p226_p7)  ;;  %v264_v51 = vld [vmem:[%s961_s26 + $0x18] sm:$0xff] (!%p226_p7)  ;;  %v261_v54 = vld [vmem:[%s961_s26] sm:$0xff] (!%p226_p7) }
  0x34   : > { %v270_v50 = vld [vmem:[%s961_s26 + $0x48] sm:$0xff] (!%p226_p7)  ;;  %v272_v53 = vld [vmem:[%s961_s26 + $0x58] sm:$0xff] (!%p226_p7)  ;;  %v269_v55 = vld [vmem:[%s961_s26 + $0x40] sm:$0xff] (!%p226_p7) }
  0x35   : > { %v707_v52 = vpack.c.bf16 (!%p226_p7), %v270_v50, %v262_v49  ;;  %v719_v56 = vpack.c.bf16 (!%p226_p7), %v272_v53, %v264_v51  ;;  %v709_v57 = vpack.c.bf16 (!%p226_p7), %v269_v55, %v261_v54  ;;  %v263_v58 = vld [vmem:[%s961_s26 + $0x10] sm:$0xff] (!%p226_p7)  ;;  %v278_v60 = vld [vmem:[%s961_s26 + $0x88] sm:$0xff] (!%p226_p7)  ;;  %v280_v63 = vld [vmem:[%s961_s26 + $0x98] sm:$0xff] (!%p226_p7) }
  0x36   : > { %v271_v59 = vld [vmem:[%s961_s26 + $0x50] sm:$0xff]  ;;  %v286_v62 = vld [vmem:[%s961_s26 + $0xc8] sm:$0xff]  ;;  %v288_v0 = vld [vmem:[%s961_s26 + $0xd8] sm:$0xff]  ;;  %s1052_s29 = smov (!%p255_p8, %s698_s29), 15 }
  0x37   : > { %708 = vmatprep.subr.bf16.mxu0 %v707_v52  ;;  %v721_v61 = vpack.c.bf16 %v271_v59, %v263_v58  ;;  %720 = vmatprep.subr.bf16.mxu1 %v719_v56  ;;  %v711_v1 = vpack.c.bf16 %v286_v62, %v278_v60  ;;  %v723_v2 = vpack.c.bf16 %v288_v0, %v280_v63  ;;  %v277_v3 = vld [vmem:[%s961_s26 + $0x80] sm:$0xff]  ;;  %v279_v5 = vld [vmem:[%s961_s26 + $0x90] sm:$0xff]  ;;  %v294_v8 = vld [vmem:[%s961_s26 + $0x108] sm:$0xff]  ;;  %s699_s30 = sshll.u32 %s1052_s29, 3 }
  0x38   : > { %710 = vmatpush1.bf16.msra.mxu0 %v709_v57  ;;  %v285_v4 = vld [vmem:[%s961_s26 + $0xc0] sm:$0xff]  ;;  %v287_v7 = vld [vmem:[%s961_s26 + $0xd0] sm:$0xff]  ;;  %v302_v9 = vld [vmem:[%s961_s26 + $0x148] sm:$0xff]  ;;  %s1025_s5 = scalar_lea.vmem %s1047_s2, %s699_s30 }
  0x39   : > { %722 = vmatpush1.bf16.msra.mxu1 %v721_v61  ;;  %v713_v6 = vpack.c.bf16 %v285_v4, %v277_v3  ;;  %712 = vmatprep.subr.bf16.mxu0 %v711_v1  ;;  %v725_v10 = vpack.c.bf16 %v287_v7, %v279_v5  ;;  %v715_v11 = vpack.c.bf16 %v302_v9, %v294_v8  ;;  %v296_v12 = vld [vmem:[%s961_s26 + $0x118] sm:$0xff]  ;;  %v293_v14 = vld [vmem:[%s961_s26 + $0x100] sm:$0xff]  ;;  %v295_v17 = vld [vmem:[%s961_s26 + $0x110] sm:$0xff] }
  0x3a   : > { %724 = vmatprep.subr.bf16.mxu1 %v723_v2  ;;  %v304_v13 = vld [vmem:[%s961_s26 + $0x158] sm:$0xff]  ;;  %v301_v16 = vld [vmem:[%s961_s26 + $0x140] sm:$0xff]  ;;  %v303_v18 = vld [vmem:[%s961_s26 + $0x150] sm:$0xff] }
  0x3b   : > { %v727_v15 = vpack.c.bf16 %v304_v13, %v296_v12  ;;  %v717_v19 = vpack.c.bf16 %v301_v16, %v293_v14  ;;  %v266_v20 = vld [vmem:[%s961_s26 + $0x28] sm:$0xff]  ;;  %v268_v22 = vld [vmem:[%s961_s26 + $0x38] sm:$0xff]  ;;  %v729_v23 = vpack.c.bf16 %v303_v18, %v295_v17  ;;  %v265_v26 = vld [vmem:[%s961_s26 + $0x20] sm:$0xff] }
  0x3c   : > { %714 = vmatpush1.bf16.msra.mxu0 %v713_v6  ;;  %v274_v21 = vld [vmem:[%s961_s26 + $0x68] sm:$0xff]  ;;  %v276_v25 = vld [vmem:[%s961_s26 + $0x78] sm:$0xff]  ;;  %v273_v27 = vld [vmem:[%s961_s26 + $0x60] sm:$0xff] }
  0x3d   : > { %726 = vmatpush1.bf16.msra.mxu1 %v725_v10  ;;  %716 = vmatprep.subr.bf16.mxu0 %v715_v11  ;;  %v731_v24 = vpack.c.bf16 %v274_v21, %v266_v20  ;;  %v743_v28 = vpack.c.bf16 %v276_v25, %v268_v22  ;;  %v267_v29 = vld [vmem:[%s961_s26 + $0x30] sm:$0xff]  ;;  %v282_v31 = vld [vmem:[%s961_s26 + $0xa8] sm:$0xff]  ;;  %v284_v33 = vld [vmem:[%s961_s26 + $0xb8] sm:$0xff]  ;;  %v733_v36 = vpack.c.bf16 %v273_v27, %v265_v26 }
  0x3e   : > { %728 = vmatprep.subr.bf16.mxu1 %v727_v15  ;;  %v275_v30 = vld [vmem:[%s961_s26 + $0x70] sm:$0xff]  ;;  %v290_v32 = vld [vmem:[%s961_s26 + $0xe8] sm:$0xff]  ;;  %v292_v34 = vld [vmem:[%s961_s26 + $0xf8] sm:$0xff] }
  0x3f   : > { %v745_v37 = vpack.c.bf16 %v275_v30, %v267_v29  ;;  %v735_v38 = vpack.c.bf16 %v290_v32, %v282_v31  ;;  %v281_v39 = vld [vmem:[%s961_s26 + $0xa0] sm:$0xff]  ;;  %v283_v41 = vld [vmem:[%s961_s26 + $0xb0] sm:$0xff]  ;;  %v747_v42 = vpack.c.bf16 %v292_v34, %v284_v33  ;;  %v298_v44 = vld [vmem:[%s961_s26 + $0x128] sm:$0xff] }
  0x40   : > { %718 = vmatpush1.bf16.msra.mxu0 %v717_v19  ;;  %v289_v40 = vld [vmem:[%s961_s26 + $0xe0] sm:$0xff]  ;;  %v291_v43 = vld [vmem:[%s961_s26 + $0xf0] sm:$0xff]  ;;  %v306_v45 = vld [vmem:[%s961_s26 + $0x168] sm:$0xff] }
  0x41   : > { %730 = vmatpush1.bf16.msra.mxu1 %v729_v23  ;;  %732 = vmatprep.subr.bf16.mxu0 %v731_v24  ;;  %v300_v46 = vld [vmem:[%s961_s26 + $0x138] sm:$0xff]  ;;  %v737_v49 = vpack.c.bf16 %v289_v40, %v281_v39  ;;  %v749_v50 = vpack.c.bf16 %v291_v43, %v283_v41  ;;  %v739_v51 = vpack.c.bf16 %v306_v45, %v298_v44  ;;  %v297_v52 = vld [vmem:[%s961_s26 + $0x120] sm:$0xff]  ;;  %v299_v55 = vld [vmem:[%s961_s26 + $0x130] sm:$0xff] }
  0x42   : > { %744 = vmatprep.subr.bf16.mxu1 %v743_v28  ;;  %v308_v47 = vld [vmem:[%s961_s26 + $0x178] sm:$0xff]  ;;  %v305_v53 = vld [vmem:[%s961_s26 + $0x160] sm:$0xff]  ;;  %v307_v56 = vld [vmem:[%s961_s26 + $0x170] sm:$0xff] }
  0x43   : > { %700 = vmatmul.mubr.msk.f32.vlgmr.msra.gmra.mrb[0].mxu0 %vm309_vm0, %v260_v35  ;;  %v751_v54 = vpack.c.bf16 %v308_v47, %v300_v46  ;;  %v741_v57 = vpack.c.bf16 %v305_v53, %v297_v52  ;;  %v753_v58 = vpack.c.bf16 %v307_v56, %v299_v55 }
  0x44   : > { %701 = vmatmul.mubr.msk.f32.vlgmr.msra.gmra.mrb[0].mxu1 %vm309_vm0, %v260_v35  ;;  %734 = vmatpush1.bf16.msra.mxu0 %v733_v36 }
  0x45   : > { %746 = vmatpush1.bf16.msra.mxu1 %v745_v37  ;;  %736 = vmatprep.subr.bf16.mxu0 %v735_v38 }
  0x46   : > { %748 = vmatprep.subr.bf16.mxu1 %v747_v42  ;;  %519 = vmatprep.mubr.f32.mxu0 %v806_v48 }
  0x47   : > { %590 = vmatprep.mubr.f32.mxu1 %v806_v48 }
  0x48   : > { %738 = vmatpush1.bf16.msra.mxu0 %v737_v49 }
  0x49   : > { %750 = vmatpush1.bf16.msra.mxu1 %v749_v50  ;;  %740 = vmatprep.subr.bf16.mxu0 %v739_v51 }
  0x4a   : > { %752 = vmatprep.subr.bf16.mxu1 %v751_v54 }
  0x4c   : > { %742 = vmatpush1.bf16.msra.mxu0 %v741_v57 }
  0x4d   : > { %754 = vmatpush1.bf16.msra.mxu1 %v753_v58 }
  0x4f   : > { %702 = vmatmul.mubr.msk.f32.vlgmr.msra.gmra.mrb[2].mxu0 %vm309_vm0, %v260_v35 }
  0x50   : > { %703 = vmatmul.mubr.msk.f32.vlgmr.msra.gmra.mrb[2].mxu1 %vm309_vm0, %v260_v35 }
 0x116   : > { %v379_v59 = vpop.f32.mrb[0].mxu0 }
 0x117   : > { %vm597_vm1 = vcmp.gt.f32.partialorder %v379_v59, 0.0  ;;  %v605_v48 = vmul.f32 0.2, %v379_v59  ;;  %v450_v60 = vpop.f32.mrb[0].mxu1  ;;  %v381_v61 = vpop.f32.mrb[1].mxu0 }
 0x118   : > { %vm599_vm2 = vcmp.gt.f32.partialorder %v450_v60, 0.0  ;;  %v607_v62 = vmul.f32 0.2, %v450_v60  ;;  %vm598_vm3 = vcmp.gt.f32.partialorder %v381_v61, 0.0  ;;  %v606_v63 = vmul.f32 0.2, %v381_v61 }
 0x119   : > { %v613_v0 = vsel %vm597_vm1, %v379_v59, %v605_v48  ;;  %v452_v1 = vpop.f32.mrb[1].mxu1 }
 0x11a   : > { %621 = vst [vmem:[%s1025_s5] sm:$0xff] %v613_v0  ;;  %v615_v2 = vsel %vm599_vm2, %v450_v60, %v607_v62  ;;  %v614_v3 = vsel %vm598_vm3, %v381_v61, %v606_v63  ;;  %vm600_vm4 = vcmp.gt.f32.partialorder %v452_v1, 0.0  ;;  %v608_v4 = vmul.f32 0.2, %v452_v1 }
 0x11b   : > { %623 = vst [vmem:[%s1025_s5 + $0x10] sm:$0xff] %v615_v2  ;;  %622 = vst [vmem:[%s1025_s5 + $0x8] sm:$0xff] %v614_v3 }
 0x11c   : > { %v616_v5 = vsel %vm600_vm4, %v452_v1, %v608_v4 }
 0x11d   : > { %624 = vst [vmem:[%s1025_s5 + $0x18] sm:$0xff] %v616_v5 }
 0x122   : > { %v521_v6 = vpop.f32.mrb[2].mxu0 }
 0x123   : > { %vm601_vm5 = vcmp.gt.f32.partialorder %v521_v6, 0.0  ;;  %v609_v7 = vmul.f32 0.2, %v521_v6  ;;  %v592_v8 = vpop.f32.mrb[2].mxu1  ;;  %v523_v9 = vpop.f32.mrb[3].mxu0 }
 0x124   : > { %vm603_vm6 = vcmp.gt.f32.partialorder %v592_v8, 0.0  ;;  %v611_v10 = vmul.f32 0.2, %v592_v8  ;;  %vm602_vm7 = vcmp.gt.f32.partialorder %v523_v9, 0.0  ;;  %v610_v11 = vmul.f32 0.2, %v523_v9 }
 0x125   : > { %v617_v12 = vsel %vm601_vm5, %v521_v6, %v609_v7  ;;  %v594_v13 = vpop.f32.mrb[3].mxu1 }
 0x126   : > { %625 = vst [vmem:[%s1025_s5 + $0x20] sm:$0xff] %v617_v12  ;;  %v619_v14 = vsel %vm603_vm6, %v592_v8, %v611_v10  ;;  %v618_v15 = vsel %vm602_vm7, %v523_v9, %v610_v11  ;;  %vm604_vm8 = vcmp.gt.f32.partialorder %v594_v13, 0.0  ;;  %v612_v16 = vmul.f32 0.2, %v594_v13 }
 0x127   : > { %627 = vst [vmem:[%s1025_s5 + $0x30] sm:$0xff] %v619_v14  ;;  %626 = vst [vmem:[%s1025_s5 + $0x28] sm:$0xff] %v618_v15 }
 0x128   : > { %v620_v17 = vsel %vm604_vm8, %v594_v13, %v612_v16 }
 0x129   : > { %628 = vst [vmem:[%s1025_s5 + $0x38] sm:$0xff] %v620_v17 }
 0x12a PF: > { %p9_p9 = scmp.ge.s32.totalorder %s839_s13, 4   ;;  %s1048_s9 = smov %s800_s10 }
 0x12b   : > { %s1049_s10 = smov %s848_s16  ;;  %s1050_s11 = smov %s839_s13 }
 0x12c   :  { %11 = sbr.rel (!%p9_p9) target bundleno = 2 (0x2), region = 86 }

// kernel: discriminator_forward.5
= control target key start
LH: loop header
LB: loop body
LE: loop exit
PB: predicated region body
PF: predicated region fallthrough
CT: control target
= control target key end

     0   :  { %v438_v3 = vmov 0.0   ;;  %s707_s1 = inlined_call_operand.vmem [shape: f32[128,512], index: 1, kind: input, shape index: {}]   ;;  %s708_s0 = inlined_call_operand.vmem [shape: f32[16,128], index: 0, kind: input, shape index: {}]   ;;  %s709_s2 = inlined_call_operand.vmem [shape: f32[16,1], index: 2, kind: input, shape index: {}]   ;;  %s710_s3 = inlined_call_operand.vmem [shape: f32[16,1], index: 3, kind: input, shape index: {}]   ;;  %s711_s4 = inlined_call_operand.vmem [shape: f32[16,512], index: 4, kind: output, shape index: {}]  }
   0x1   :  { %v20_v0 = vld [vmem:[%s707_s1 + $0x8] sm:$0xff]  ;;  %v19_v2 = vld [vmem:[%s707_s1] sm:$0xff]  ;;  %147 = vmatprep.mubr.f32.mxu0 %v438_v3  ;;  %224 = vmatprep.mubr.f32.mxu1 %v438_v3  ;;  %v22_v6 = vld [vmem:[%s707_s1 + $0x18] sm:$0xff] }
   0x2   :  { %v24_v1 = vld [vmem:[%s707_s1 + $0x28] sm:$0xff]  ;;  %v23_v5 = vld [vmem:[%s707_s1 + $0x20] sm:$0xff]  ;;  %v26_v7 = vld [vmem:[%s707_s1 + $0x38] sm:$0xff] }
   0x3   :  { %v366_v4 = vpack.c.bf16 %v24_v1, %v20_v0  ;;  %v368_v8 = vpack.c.bf16 %v23_v5, %v19_v2  ;;  %v398_v9 = vpack.c.bf16 %v26_v7, %v22_v6  ;;  %v21_v10 = vld [vmem:[%s707_s1 + $0x10] sm:$0xff]  ;;  %v28_v12 = vld [vmem:[%s707_s1 + $0x48] sm:$0xff]  ;;  %v27_v15 = vld [vmem:[%s707_s1 + $0x40] sm:$0xff] }
   0x4   :  { %v25_v11 = vld [vmem:[%s707_s1 + $0x30] sm:$0xff]  ;;  %v32_v14 = vld [vmem:[%s707_s1 + $0x68] sm:$0xff]  ;;  %v31_v16 = vld [vmem:[%s707_s1 + $0x60] sm:$0xff] }
   0x5   :  { %367 = vmatprep.subr.bf16.mxu0 %v366_v4  ;;  %v400_v13 = vpack.c.bf16 %v25_v11, %v21_v10  ;;  %399 = vmatprep.subr.bf16.mxu1 %v398_v9  ;;  %v370_v17 = vpack.c.bf16 %v32_v14, %v28_v12  ;;  %v372_v18 = vpack.c.bf16 %v31_v16, %v27_v15  ;;  %v30_v19 = vld [vmem:[%s707_s1 + $0x58] sm:$0xff]  ;;  %v29_v21 = vld [vmem:[%s707_s1 + $0x50] sm:$0xff]  ;;  %v36_v24 = vld [vmem:[%s707_s1 + $0x88] sm:$0xff] }
   0x6   :  { %369 = vmatpush1.bf16.msra.mxu0 %v368_v8  ;;  %v34_v20 = vld [vmem:[%s707_s1 + $0x78] sm:$0xff]  ;;  %v33_v23 = vld [vmem:[%s707_s1 + $0x70] sm:$0xff]  ;;  %v40_v25 = vld [vmem:[%s707_s1 + $0xa8] sm:$0xff] }
   0x7   :  { %401 = vmatpush1.bf16.msra.mxu1 %v400_v13  ;;  %v402_v22 = vpack.c.bf16 %v34_v20, %v30_v19  ;;  %371 = vmatprep.subr.bf16.mxu0 %v370_v17  ;;  %v404_v26 = vpack.c.bf16 %v33_v23, %v29_v21  ;;  %v374_v27 = vpack.c.bf16 %v40_v25, %v36_v24  ;;  %v35_v28 = vld [vmem:[%s707_s1 + $0x80] sm:$0xff]  ;;  %v38_v30 = vld [vmem:[%s707_s1 + $0x98] sm:$0xff]  ;;  %v37_v32 = vld [vmem:[%s707_s1 + $0x90] sm:$0xff] }
   0x8   :  { %v39_v29 = vld [vmem:[%s707_s1 + $0xa0] sm:$0xff]  ;;  %v42_v31 = vld [vmem:[%s707_s1 + $0xb8] sm:$0xff]  ;;  %v41_v33 = vld [vmem:[%s707_s1 + $0xb0] sm:$0xff] }
   0x9   :  { %403 = vmatprep.subr.bf16.mxu1 %v402_v22  ;;  %v376_v34 = vpack.c.bf16 %v39_v29, %v35_v28  ;;  %v406_v35 = vpack.c.bf16 %v42_v31, %v38_v30  ;;  %v44_v36 = vld [vmem:[%s707_s1 + $0xc8] sm:$0xff]  ;;  %v43_v38 = vld [vmem:[%s707_s1 + $0xc0] sm:$0xff]  ;;  %v408_v39 = vpack.c.bf16 %v41_v33, %v37_v32  ;;  %v46_v42 = vld [vmem:[%s707_s1 + $0xd8] sm:$0xff] }
   0xa   :  { %373 = vmatpush1.bf16.msra.mxu0 %v372_v18  ;;  %v48_v37 = vld [vmem:[%s707_s1 + $0xe8] sm:$0xff]  ;;  %v47_v41 = vld [vmem:[%s707_s1 + $0xe0] sm:$0xff]  ;;  %v50_v43 = vld [vmem:[%s707_s1 + $0xf8] sm:$0xff] }
   0xb   :  { %405 = vmatpush1.bf16.msra.mxu1 %v404_v26  ;;  %375 = vmatprep.subr.bf16.mxu0 %v374_v27  ;;  %v378_v40 = vpack.c.bf16 %v48_v37, %v44_v36  ;;  %v410_v44 = vpack.c.bf16 %v50_v43, %v46_v42  ;;  %v45_v45 = vld [vmem:[%s707_s1 + $0xd0] sm:$0xff]  ;;  %v52_v47 = vld [vmem:[%s707_s1 + $0x108] sm:$0xff]  ;;  %v380_v49 = vpack.c.bf16 %v47_v41, %v43_v38  ;;  %v54_v50 = vld [vmem:[%s707_s1 + $0x118] sm:$0xff]  ;;  %v439_v36 = vmov 0  }
   0xc   :  { %407 = vmatprep.subr.bf16.mxu1 %v406_v35  ;;  %v49_v46 = vld [vmem:[%s707_s1 + $0xf0] sm:$0xff]  ;;  %v56_v48 = vld [vmem:[%s707_s1 + $0x128] sm:$0xff]  ;;  %v58_v51 = vld [vmem:[%s707_s1 + $0x138] sm:$0xff]  ;;  %433 = vset.pattern.permute.xlu1 %v439_v36 }
   0xd   :  { %v412_v52 = vpack.c.bf16 %v49_v46, %v45_v45  ;;  %v382_v53 = vpack.c.bf16 %v56_v48, %v52_v47  ;;  %v51_v54 = vld [vmem:[%s707_s1 + $0x100] sm:$0xff]  ;;  %v53_v56 = vld [vmem:[%s707_s1 + $0x110] sm:$0xff]  ;;  %v414_v57 = vpack.c.bf16 %v58_v51, %v54_v50  ;;  %v60_v59 = vld [vmem:[%s707_s1 + $0x148] sm:$0xff]  ;;  %432 = vset.pattern.permute.xlu0 %v439_v36 }
   0xe   :  { %377 = vmatpush1.bf16.msra.mxu0 %v376_v34  ;;  %v55_v55 = vld [vmem:[%s707_s1 + $0x120] sm:$0xff]  ;;  %v57_v58 = vld [vmem:[%s707_s1 + $0x130] sm:$0xff]  ;;  %v64_v60 = vld [vmem:[%s707_s1 + $0x168] sm:$0xff] }
   0xf   :  { %409 = vmatpush1.bf16.msra.mxu1 %v408_v39  ;;  %379 = vmatprep.subr.bf16.mxu0 %v378_v40  ;;  %v62_v61 = vld [vmem:[%s707_s1 + $0x158] sm:$0xff]  ;;  %v384_v63 = vpack.c.bf16 %v55_v55, %v51_v54  ;;  %v416_v0 = vpack.c.bf16 %v57_v58, %v53_v56  ;;  %v386_v1 = vpack.c.bf16 %v64_v60, %v60_v59  ;;  %v59_v2 = vld [vmem:[%s707_s1 + $0x140] sm:$0xff]  ;;  %v61_v5 = vld [vmem:[%s707_s1 + $0x150] sm:$0xff] }
  0x10   :  { %411 = vmatprep.subr.bf16.mxu1 %v410_v44  ;;  %v66_v62 = vld [vmem:[%s707_s1 + $0x178] sm:$0xff]  ;;  %v63_v4 = vld [vmem:[%s707_s1 + $0x160] sm:$0xff]  ;;  %v65_v7 = vld [vmem:[%s707_s1 + $0x170] sm:$0xff] }
  0x11   :  { %v418_v6 = vpack.c.bf16 %v66_v62, %v62_v61  ;;  %v68_v8 = vld [vmem:[%s707_s1 + $0x188] sm:$0xff]  ;;  %v70_v10 = vld [vmem:[%s707_s1 + $0x198] sm:$0xff]  ;;  %v388_v12 = vpack.c.bf16 %v63_v4, %v59_v2  ;;  %v420_v13 = vpack.c.bf16 %v65_v7, %v61_v5  ;;  %v67_v15 = vld [vmem:[%s707_s1 + $0x180] sm:$0xff] }
  0x12   :  { %381 = vmatpush1.bf16.msra.mxu0 %v380_v49  ;;  %v72_v9 = vld [vmem:[%s707_s1 + $0x1a8] sm:$0xff]  ;;  %v74_v11 = vld [vmem:[%s707_s1 + $0x1b8] sm:$0xff]  ;;  %v71_v16 = vld [vmem:[%s707_s1 + $0x1a0] sm:$0xff] }
  0x13   :  { %413 = vmatpush1.bf16.msra.mxu1 %v412_v52  ;;  %383 = vmatprep.subr.bf16.mxu0 %v382_v53  ;;  %v390_v14 = vpack.c.bf16 %v72_v9, %v68_v8  ;;  %v69_v17 = vld [vmem:[%s707_s1 + $0x190] sm:$0xff]  ;;  %v422_v18 = vpack.c.bf16 %v74_v11, %v70_v10  ;;  %v76_v20 = vld [vmem:[%s707_s1 + $0x1c8] sm:$0xff]  ;;  %v78_v22 = vld [vmem:[%s707_s1 + $0x1d8] sm:$0xff]  ;;  %v392_v24 = vpack.c.bf16 %v71_v16, %v67_v15 }
  0x14   :  { %415 = vmatprep.subr.bf16.mxu1 %v414_v57  ;;  %v73_v19 = vld [vmem:[%s707_s1 + $0x1b0] sm:$0xff]  ;;  %v80_v21 = vld [vmem:[%s707_s1 + $0x1e8] sm:$0xff]  ;;  %v82_v23 = vld [vmem:[%s707_s1 + $0x1f8] sm:$0xff] }
  0x15   :  { %v424_v25 = vpack.c.bf16 %v73_v19, %v69_v17  ;;  %v394_v26 = vpack.c.bf16 %v80_v21, %v76_v20  ;;  %v75_v27 = vld [vmem:[%s707_s1 + $0x1c0] sm:$0xff]  ;;  %v426_v29 = vpack.c.bf16 %v82_v23, %v78_v22  ;;  %v77_v30 = vld [vmem:[%s707_s1 + $0x1d0] sm:$0xff]  ;;  %v18_v35 = vld [vmem:[%s708_s0 + $0x8] sm:$0xff] }
  0x16   :  { %385 = vmatpush1.bf16.msra.mxu0 %v384_v63  ;;  %v79_v28 = vld [vmem:[%s707_s1 + $0x1e0] sm:$0xff]  ;;  %v81_v31 = vld [vmem:[%s707_s1 + $0x1f0] sm:$0xff]  ;;  %v291_v37 = vld [vmem:[%s709_s2 + $0x8] sm:$0xff] }
  0x17   :  { %417 = vmatpush1.bf16.msra.mxu1 %v416_v0  ;;  %387 = vmatprep.subr.bf16.mxu0 %v386_v1  ;;  %v396_v32 = vpack.c.bf16 %v79_v28, %v75_v27  ;;  %v428_v33 = vpack.c.bf16 %v81_v31, %v77_v30  ;;  %v17_v34 = vld [vmem:[%s708_s0] sm:$0xff]  ;;  %v311_v16 = vld [vmem:[%s710_s3 + $0x8] sm:$0xff] }
  0x18   :  { %419 = vmatprep.subr.bf16.mxu1 %v418_v6  ;;  %299 = vperm.xlu1 %433, %v291_v37   ;;  %v310_v38 = vld [vmem:[%s710_s3] sm:$0xff] }
  0x19   :  { %v290_v52 = vld [vmem:[%s709_s2] sm:$0xff] }
  0x1a   :  { %389 = vmatpush1.bf16.msra.mxu0 %v388_v12 }
  0x1b   :  { %421 = vmatpush1.bf16.msra.mxu1 %v420_v13  ;;  %391 = vmatprep.subr.bf16.mxu0 %v390_v14 }
  0x1c   :  { %423 = vmatprep.subr.bf16.mxu1 %v422_v18  ;;  %314 = vperm.xlu1 %433, %v310_v38  }
  0x1e   :  { %393 = vmatpush1.bf16.msra.mxu0 %v392_v24 }
  0x1f   :  { %425 = vmatpush1.bf16.msra.mxu1 %v424_v25  ;;  %395 = vmatprep.subr.bf16.mxu0 %v394_v26 }
  0x20   :  { %427 = vmatprep.subr.bf16.mxu1 %v426_v29 }
  0x22   :  { %397 = vmatpush1.bf16.msra.mxu0 %v396_v32 }
  0x23   :  { %429 = vmatpush1.bf16.msra.mxu1 %v428_v33 }
  0x25   :  { %148 = vmatmul.mubr.f32.vlgmr.msra.gmra.mrb[0].mxu0 %v17_v34 }
  0x26   :  { %225 = vmatmul.mubr.f32.vlgmr.msra.gmra.mrb[0].mxu1 %v17_v34  ;;  %153 = vmatprep.mubr.f32.mxu0 %v438_v3 }
  0x27   :  { %230 = vmatprep.mubr.f32.mxu1 %v438_v3 }
  0x29   :  { %154 = vmatmul.mubr.f32.gmra.mrb[2].mxu0 %v18_v35 }
  0x2a   :  { %231 = vmatmul.mubr.f32.gmra.mrb[2].mxu1 %v18_v35 }
  0x97   :  { %v300_v17 = vpop.permute.xlu1 %299 }
  0x9b   :  { %v315_v18 = vpop.permute.xlu1 %314 }
  0xf8   :  { %v149_v39 = vpop.f32.mrb[0].mxu0 }
  0xf9   :  { %v151_v40 = vpop.f32.mrb[1].mxu0  ;;  %v226_v41 = vpop.f32.mrb[0].mxu1 }
  0xfa   :  { %v237_v42 = vadd.f32 %v151_v40, %v149_v39  ;;  %v228_v3 = vpop.f32.mrb[1].mxu1 }
  0xfc   :  { %v238_v43 = vadd.f32 %v237_v42, %v226_v41  ;;  %v155_v44 = vpop.f32.mrb[2].mxu0 }
  0xfd   :  { %v157_v45 = vpop.f32.mrb[3].mxu0  ;;  %v232_v46 = vpop.f32.mrb[2].mxu1 }
  0xfe   :  { %v242_v47 = vadd.f32 %v157_v45, %v155_v44  ;;  %v234_v48 = vpop.f32.mrb[3].mxu1  ;;  %v239_v49 = vadd.f32 %v238_v43, %v228_v3 }
 0x100   :  { %v243_v50 = vadd.f32 %v242_v47, %v232_v46  ;;  %240 = vadd.xlane.f32.xlu0 %v239_v49 }
 0x102   :  { %v244_v51 = vadd.f32 %v243_v50, %v234_v48 }
 0x104   :  { %245 = vadd.xlane.f32.xlu0 %v244_v51 }
 0x11a   :  { %294 = vperm.xlu0 %432, %v290_v52  }
 0x18d   :  { %v241_v53 = vpop.xlane.xlu0 %240 }
 0x18e   :  { %v248_v54 = vmul.f32 0.001953125, %v241_v53 }
 0x190   :  { %v250_v55 = vsub.f32 %v149_v39, %v248_v54  ;;  %v251_v56 = vsub.f32 %v151_v40, %v248_v54  ;;  %v252_v57 = vsub.f32 %v226_v41, %v248_v54  ;;  %v253_v59 = vsub.f32 %v228_v3, %v248_v54 }
 0x191   :  { %v246_v58 = vpop.xlane.xlu0 %245 }
 0x192   :  { %v249_v60 = vmul.f32 0.001953125, %v246_v58  ;;  %v258_v61 = vmul.f32 %v250_v55, %v250_v55  ;;  %v259_v62 = vmul.f32 %v251_v56, %v251_v56  ;;  %v260_v63 = vmul.f32 %v252_v57, %v252_v57 }
 0x193   :  { %v261_v5 = vmul.f32 %v253_v59, %v253_v59 }
 0x194   :  { %v254_v0 = vsub.f32 %v155_v44, %v249_v60  ;;  %v255_v1 = vsub.f32 %v157_v45, %v249_v60  ;;  %v266_v2 = vadd.f32 %v259_v62, %v258_v61  ;;  %v256_v4 = vsub.f32 %v232_v46, %v249_v60 }
 0x195   :  { %v257_v7 = vsub.f32 %v234_v48, %v249_v60 }
 0x196   :  { %v267_v6 = vadd.f32 %v266_v2, %v260_v63  ;;  %v262_v8 = vmul.f32 %v254_v0, %v254_v0  ;;  %v263_v9 = vmul.f32 %v255_v1, %v255_v1  ;;  %v264_v11 = vmul.f32 %v256_v4, %v256_v4 }
 0x197   :  { %v265_v13 = vmul.f32 %v257_v7, %v257_v7 }
 0x198   :  { %v268_v10 = vadd.f32 %v267_v6, %v261_v5  ;;  %v271_v12 = vadd.f32 %v263_v9, %v262_v8 }
 0x199   :  { %v295_v26 = vpop.permute.xlu0 %294 }
 0x19a   :  { %269 = vadd.xlane.f32.xlu1 %v268_v10  ;;  %v272_v14 = vadd.f32 %v271_v12, %v264_v11 }
 0x19c   :  { %v273_v15 = vadd.f32 %v272_v14, %v265_v13 }
 0x19e   :  { %274 = vadd.xlane.f32.xlu1 %v273_v15 }
 0x1af   :  { %319 = vperm.xlu1 %433, %v311_v16  }
 0x227   :  { %v270_v19 = vpop.xlane.xlu1 %269 }
 0x228   :  { %v276_v20 = vmul.f32 0.001953125, %v270_v19 }
 0x22a   :  { %v278_v21 = vadd.f32 1e-05, %v276_v20 }
 0x22b   :  { %v275_v22 = vpop.xlane.xlu1 %274 }
 0x22c   :  { %434 = vrsqrt.f32 %v278_v21  ;;  %v277_v23 = vmul.f32 0.001953125, %v275_v22 }
 0x22e   :  { %v279_v24 = vadd.f32 1e-05, %v277_v23 }
 0x22f   :  { %v320_v47 = vpop.permute.xlu1 %319 }
 0x230   :  { %436 = vrsqrt.f32 %v279_v24 }
 0x236   :  { %v435_v25 = vpop.eup %434 }
 0x237   :  { %v282_v27 = vmul.f32 %v435_v25, %v250_v55  ;;  %v283_v28 = vmul.f32 %v435_v25, %v251_v56  ;;  %v284_v29 = vmul.f32 %v435_v25, %v252_v57  ;;  %v285_v30 = vmul.f32 %v435_v25, %v253_v59 }
 0x239   :  { %v302_v31 = vmul.f32 %v295_v26, %v282_v27  ;;  %v303_v32 = vmul.f32 %v295_v26, %v283_v28  ;;  %v304_v33 = vmul.f32 %v295_v26, %v284_v29  ;;  %v305_v34 = vmul.f32 %v295_v26, %v285_v30 }
 0x23a   :  { %v437_v35 = vpop.eup %436 }
 0x23b   :  { %v286_v36 = vmul.f32 %v437_v35, %v254_v0  ;;  %v287_v37 = vmul.f32 %v437_v35, %v255_v1  ;;  %v288_v38 = vmul.f32 %v437_v35, %v256_v4  ;;  %v289_v39 = vmul.f32 %v437_v35, %v257_v7 }
 0x23c   :  { %v322_v40 = vadd.f32 %v315_v18, %v302_v31  ;;  %v323_v41 = vadd.f32 %v315_v18, %v303_v32  ;;  %v324_v42 = vadd.f32 %v315_v18, %v304_v33  ;;  %v325_v3 = vadd.f32 %v315_v18, %v305_v34 }
 0x23d   :  { %v306_v43 = vmul.f32 %v300_v17, %v286_v36  ;;  %v307_v44 = vmul.f32 %v300_v17, %v287_v37  ;;  %v308_v45 = vmul.f32 %v300_v17, %v288_v38  ;;  %v309_v46 = vmul.f32 %v300_v17, %v289_v39 }
 0x23e   :  { %vm330_vm0 = vcmp.gt.f32.partialorder %v322_v40, 0.0  ;;  %vm331_vm1 = vcmp.gt.f32.partialorder %v323_v41, 0.0  ;;  %vm332_vm2 = vcmp.gt.f32.partialorder %v324_v42, 0.0  ;;  %vm333_vm3 = vcmp.gt.f32.partialorder %v325_v3, 0.0 }
 0x23f   :  { %v326_v48 = vadd.f32 %v320_v47, %v306_v43  ;;  %v327_v49 = vadd.f32 %v320_v47, %v307_v44  ;;  %v328_v50 = vadd.f32 %v320_v47, %v308_v45  ;;  %v329_v51 = vadd.f32 %v320_v47, %v309_v46 }
 0x240   :  { %v338_v52 = vmul.f32 0.2, %v322_v40  ;;  %v339_v53 = vmul.f32 0.2, %v323_v41  ;;  %v340_v54 = vmul.f32 0.2, %v324_v42 }
 0x241   :  { %vm334_vm4 = vcmp.gt.f32.partialorder %v326_v48, 0.0  ;;  %vm335_vm5 = vcmp.gt.f32.partialorder %v327_v49, 0.0  ;;  %vm336_vm6 = vcmp.gt.f32.partialorder %v328_v50, 0.0  ;;  %vm337_vm7 = vcmp.gt.f32.partialorder %v329_v51, 0.0 }
 0x242   :  { %v342_v55 = vmul.f32 0.2, %v326_v48  ;;  %v343_v56 = vmul.f32 0.2, %v327_v49  ;;  %v344_v57 = vmul.f32 0.2, %v328_v50  ;;  %v346_v58 = vsel %vm330_vm0, %v322_v40, %v338_v52 }
 0x243   :  { %v345_v59 = vmul.f32 0.2, %v329_v51  ;;  %v341_v60 = vmul.f32 0.2, %v325_v3  ;;  %v347_v61 = vsel %vm331_vm1, %v323_v41, %v339_v53  ;;  %v348_v62 = vsel %vm332_vm2, %v324_v42, %v340_v54  ;;  %354 = vst [vmem:[%s711_s4] sm:$0xff] %v346_v58 }
 0x244   :  { %v350_v63 = vsel %vm334_vm4, %v326_v48, %v342_v55  ;;  %v351_v0 = vsel %vm335_vm5, %v327_v49, %v343_v56  ;;  %v352_v1 = vsel %vm336_vm6, %v328_v50, %v344_v57  ;;  %355 = vst [vmem:[%s711_s4 + $0x8] sm:$0xff] %v347_v61  ;;  %356 = vst [vmem:[%s711_s4 + $0x10] sm:$0xff] %v348_v62 }
 0x245   :  { %v353_v2 = vsel %vm337_vm7, %v329_v51, %v345_v59  ;;  %358 = vst [vmem:[%s711_s4 + $0x20] sm:$0xff] %v350_v63  ;;  %359 = vst [vmem:[%s711_s4 + $0x28] sm:$0xff] %v351_v0  ;;  %v349_v4 = vsel %vm333_vm3, %v325_v3, %v341_v60 }
 0x246   :  { %360 = vst [vmem:[%s711_s4 + $0x30] sm:$0xff] %v352_v1  ;;  %361 = vst [vmem:[%s711_s4 + $0x38] sm:$0xff] %v353_v2 }
 0x247   :  { %357 = vst [vmem:[%s711_s4 + $0x18] sm:$0xff] %v349_v4 }

// kernel: discriminator_forward.6
= control target key start
LH: loop header
LB: loop body
LE: loop exit
PB: predicated region body
PF: predicated region fallthrough
CT: control target
= control target key end

     0   :  { %v366_v56 = vmov 0   ;;  %s548_s1 = inlined_call_operand.vmem [shape: f32[256,128], index: 1, kind: input, shape index: {}]   ;;  %s549_s0 = inlined_call_operand.vmem [shape: f32[32,256], index: 0, kind: input, shape index: {}]   ;;  %s550_s2 = inlined_call_operand.vmem [shape: f32[32,1], index: 2, kind: input, shape index: {}]   ;;  %s551_s3 = inlined_call_operand.vmem [shape: f32[32,1], index: 3, kind: input, shape index: {}]   ;;  %s552_s4 = inlined_call_operand.vmem [shape: f32[32,128], index: 4, kind: output, shape index: {}]  }
   0x1   :  { %v41_v0 = vld [vmem:[%s548_s1 + $0x80] sm:$0xff]  ;;  %v42_v1 = vld [vmem:[%s548_s1 + $0x88] sm:$0xff]  ;;  %v43_v5 = vld [vmem:[%s548_s1 + $0x90] sm:$0xff]  ;;  %357 = vset.pattern.permute.xlu1 %v366_v56  ;;  %356 = vset.pattern.permute.xlu0 %v366_v56 }
   0x2   :  { %v25_v2 = vld [vmem:[%s548_s1] sm:$0xff]  ;;  %v307_v3 = vpack.c.bf16 %v42_v1, %v41_v0  ;;  %v26_v4 = vld [vmem:[%s548_s1 + $0x8] sm:$0xff]  ;;  %v44_v6 = vld [vmem:[%s548_s1 + $0x98] sm:$0xff] }
   0x3   :  { %v309_v7 = vpack.c.bf16 %v26_v4, %v25_v2  ;;  %v311_v8 = vpack.c.bf16 %v44_v6, %v43_v5  ;;  %v27_v9 = vld [vmem:[%s548_s1 + $0x10] sm:$0xff]  ;;  %v28_v10 = vld [vmem:[%s548_s1 + $0x18] sm:$0xff]  ;;  %v45_v11 = vld [vmem:[%s548_s1 + $0xa0] sm:$0xff] }
   0x4   :  { %308 = vmatprep.subr.bf16.mxu0 %v307_v3  ;;  %339 = vmatprep.subr.bf16.mxu1 %v307_v3  ;;  %v46_v12 = vld [vmem:[%s548_s1 + $0xa8] sm:$0xff]  ;;  %v313_v13 = vpack.c.bf16 %v28_v10, %v27_v9  ;;  %v29_v15 = vld [vmem:[%s548_s1 + $0x20] sm:$0xff]  ;;  %v47_v17 = vld [vmem:[%s548_s1 + $0xb0] sm:$0xff] }
   0x5   :  { %310 = vmatpush3.bf16.msra.mxu0 %v309_v7  ;;  %347 = vmatpush3.bf16.msra.mxu1 %v309_v7  ;;  %v315_v14 = vpack.c.bf16 %v46_v12, %v45_v11  ;;  %v30_v16 = vld [vmem:[%s548_s1 + $0x28] sm:$0xff]  ;;  %v48_v18 = vld [vmem:[%s548_s1 + $0xb8] sm:$0xff]  ;;  %v31_v21 = vld [vmem:[%s548_s1 + $0x30] sm:$0xff] }
   0x6   :  { %312 = vmatprep.subr.bf16.mxu0 %v311_v8  ;;  %340 = vmatprep.subr.bf16.mxu1 %v311_v8  ;;  %v317_v19 = vpack.c.bf16 %v30_v16, %v29_v15  ;;  %v319_v20 = vpack.c.bf16 %v48_v18, %v47_v17  ;;  %v32_v22 = vld [vmem:[%s548_s1 + $0x38] sm:$0xff]  ;;  %v49_v23 = vld [vmem:[%s548_s1 + $0xc0] sm:$0xff]  ;;  %v50_v24 = vld [vmem:[%s548_s1 + $0xc8] sm:$0xff] }
   0x7   :  { %v18_v25 = vld [vmem:[%s549_s0 + $0x8] sm:$0xff]  ;;  %v321_v27 = vpack.c.bf16 %v32_v22, %v31_v21  ;;  %v323_v28 = vpack.c.bf16 %v50_v24, %v49_v23  ;;  %v33_v29 = vld [vmem:[%s548_s1 + $0x40] sm:$0xff]  ;;  %v51_v31 = vld [vmem:[%s548_s1 + $0xd0] sm:$0xff] }
   0x8   :  { %121 = vmatprep.mubr.f32.mxu0 %v18_v25  ;;  %v22_v26 = vld [vmem:[%s549_s0 + $0x28] sm:$0xff]  ;;  %v52_v32 = vld [vmem:[%s548_s1 + $0xd8] sm:$0xff]  ;;  %v35_v35 = vld [vmem:[%s548_s1 + $0x50] sm:$0xff] }
   0x9   :  { %314 = vmatpush3.bf16.msra.mxu0 %v313_v13  ;;  %348 = vmatpush3.bf16.msra.mxu1 %v313_v13  ;;  %v34_v30 = vld [vmem:[%s548_s1 + $0x48] sm:$0xff]  ;;  %v327_v34 = vpack.c.bf16 %v52_v32, %v51_v31  ;;  %v36_v36 = vld [vmem:[%s548_s1 + $0x58] sm:$0xff]  ;;  %v53_v37 = vld [vmem:[%s548_s1 + $0xe0] sm:$0xff] }
   0xa   :  { %316 = vmatprep.subr.bf16.mxu0 %v315_v14  ;;  %341 = vmatprep.subr.bf16.mxu1 %v315_v14  ;;  %v325_v33 = vpack.c.bf16 %v34_v30, %v33_v29  ;;  %v54_v38 = vld [vmem:[%s548_s1 + $0xe8] sm:$0xff]  ;;  %v329_v39 = vpack.c.bf16 %v36_v36, %v35_v35  ;;  %v37_v41 = vld [vmem:[%s548_s1 + $0x60] sm:$0xff]  ;;  %v55_v43 = vld [vmem:[%s548_s1 + $0xf0] sm:$0xff] }
   0xb   :  { %131 = vmatprep.mubr.f32.mxu1 %v22_v26  ;;  %v331_v40 = vpack.c.bf16 %v54_v38, %v53_v37  ;;  %v38_v42 = vld [vmem:[%s548_s1 + $0x68] sm:$0xff]  ;;  %v56_v44 = vld [vmem:[%s548_s1 + $0xf8] sm:$0xff]  ;;  %v39_v47 = vld [vmem:[%s548_s1 + $0x70] sm:$0xff] }
   0xc   :  { %v333_v45 = vpack.c.bf16 %v38_v42, %v37_v41  ;;  %v335_v46 = vpack.c.bf16 %v56_v44, %v55_v43  ;;  %v40_v48 = vld [vmem:[%s548_s1 + $0x78] sm:$0xff]  ;;  %v17_v50 = vld [vmem:[%s549_s0] sm:$0xff]  ;;  %v19_v54 = vld [vmem:[%s549_s0 + $0x10] sm:$0xff] }
   0xd   :  { %318 = vmatpush3.bf16.msra.mxu0 %v317_v19  ;;  %349 = vmatpush3.bf16.msra.mxu1 %v317_v19  ;;  %v337_v49 = vpack.c.bf16 %v40_v48, %v39_v47  ;;  %v21_v51 = vld [vmem:[%s549_s0 + $0x20] sm:$0xff]  ;;  %v20_v52 = vld [vmem:[%s549_s0 + $0x18] sm:$0xff]  ;;  %v23_v55 = vld [vmem:[%s549_s0 + $0x30] sm:$0xff] }
   0xe   :  { %320 = vmatprep.subr.bf16.mxu0 %v319_v20  ;;  %342 = vmatprep.subr.bf16.mxu1 %v319_v20  ;;  %v24_v53 = vld [vmem:[%s549_s0 + $0x38] sm:$0xff]  ;;  %v188_v5 = vld [vmem:[%s550_s2 + $0x8] sm:$0xff]  ;;  %v189_v6 = vld [vmem:[%s550_s2 + $0x10] sm:$0xff] }
   0xf   :  { %v190_v7 = vld [vmem:[%s550_s2 + $0x18] sm:$0xff]  ;;  %v215_v8 = vld [vmem:[%s551_s3] sm:$0xff]  ;;  %v216_v9 = vld [vmem:[%s551_s3 + $0x8] sm:$0xff] }
  0x10   :  { %v217_v10 = vld [vmem:[%s551_s3 + $0x10] sm:$0xff] }
  0x11   :  { %322 = vmatpush3.bf16.msra.mxu0 %v321_v27  ;;  %350 = vmatpush3.bf16.msra.mxu1 %v321_v27  ;;  %v218_v27 = vld [vmem:[%s551_s3 + $0x18] sm:$0xff] }
  0x12   :  { %324 = vmatprep.subr.bf16.mxu0 %v323_v28  ;;  %343 = vmatprep.subr.bf16.mxu1 %v323_v28  ;;  %v187_v28 = vld [vmem:[%s550_s2] sm:$0xff] }
  0x15   :  { %326 = vmatpush3.bf16.msra.mxu0 %v325_v33  ;;  %351 = vmatpush3.bf16.msra.mxu1 %v325_v33 }
  0x16   :  { %328 = vmatprep.subr.bf16.mxu0 %v327_v34  ;;  %344 = vmatprep.subr.bf16.mxu1 %v327_v34 }
  0x19   :  { %330 = vmatpush3.bf16.msra.mxu0 %v329_v39  ;;  %352 = vmatpush3.bf16.msra.mxu1 %v329_v39 }
  0x1a   :  { %332 = vmatprep.subr.bf16.mxu0 %v331_v40  ;;  %345 = vmatprep.subr.bf16.mxu1 %v331_v40 }
  0x1d   :  { %334 = vmatpush3.bf16.msra.mxu0 %v333_v45  ;;  %353 = vmatpush3.bf16.msra.mxu1 %v333_v45 }
  0x1e   :  { %336 = vmatprep.subr.bf16.mxu0 %v335_v46  ;;  %346 = vmatprep.subr.bf16.mxu1 %v335_v46 }
  0x21   :  { %338 = vmatpush3.bf16.msra.mxu0 %v337_v49  ;;  %354 = vmatpush3.bf16.msra.mxu1 %v337_v49 }
  0x24   :  { %122 = vmatmul.mubr.f32.vlgmr.msra.gmra.mrb[0].mxu0 %v17_v50  ;;  %132 = vmatmul.mubr.f32.vlgmr.msra.gmra.mrb[0].mxu1 %v21_v51 }
  0x25   :  { %126 = vmatprep.mubr.f32.mxu0 %v20_v52  ;;  %136 = vmatprep.mubr.f32.mxu1 %v24_v53 }
  0x28   :  { %127 = vmatmul.mubr.f32.gmra.mrb[2].mxu0 %v19_v54  ;;  %137 = vmatmul.mubr.f32.gmra.mrb[2].mxu1 %v23_v55 }
  0xf7   :  { %v295_v57 = vpop.f32.mrb[0].mxu0  ;;  %v301_v58 = vpop.f32.mrb[0].mxu1 }
  0xf8   :  { %v296_v59 = vpop.f32.mrb[1].mxu0  ;;  %v302_v60 = vpop.f32.mrb[1].mxu1 }
  0xf9   :  { %v297_v61 = vadd.f32 %v296_v59, %v295_v57  ;;  %v303_v62 = vadd.f32 %v302_v60, %v301_v58 }
  0xfb   :  { %v304_v63 = vpop.f32.mrb[2].mxu1  ;;  %146 = vadd.xlane.f32.xlu1 %v303_v62  ;;  %v298_v0 = vpop.f32.mrb[2].mxu0  ;;  %142 = vadd.xlane.f32.xlu0 %v297_v61 }
  0xfc   :  { %v299_v1 = vpop.f32.mrb[3].mxu0  ;;  %v305_v2 = vpop.f32.mrb[3].mxu1 }
  0xfd   :  { %v300_v3 = vadd.f32 %v299_v1, %v298_v0  ;;  %v306_v4 = vadd.f32 %v305_v2, %v304_v63 }
  0xff   :  { %148 = vadd.xlane.f32.xlu1 %v306_v4  ;;  %144 = vadd.xlane.f32.xlu0 %v300_v3 }
 0x110   :  { %198 = vperm.xlu1 %357, %v188_v5  }
 0x114   :  { %203 = vperm.xlu1 %357, %v189_v6  }
 0x118   :  { %208 = vperm.xlu1 %357, %v190_v7  }
 0x11c   :  { %221 = vperm.xlu1 %357, %v215_v8  }
 0x120   :  { %226 = vperm.xlu1 %357, %v216_v9  }
 0x124   :  { %231 = vperm.xlu1 %357, %v217_v10  }
 0x188   :  { %v147_v11 = vpop.xlane.xlu1 %146  ;;  %v143_v12 = vpop.xlane.xlu0 %142 }
 0x189   :  { %v153_v13 = vmul.f32 0.0078125, %v147_v11  ;;  %v151_v14 = vmul.f32 0.0078125, %v143_v12 }
 0x18b   :  { %v155_v15 = vsub.f32 %v297_v61, %v151_v14  ;;  %v157_v18 = vsub.f32 %v303_v62, %v153_v13 }
 0x18c   :  { %v149_v16 = vpop.xlane.xlu1 %148  ;;  %v145_v17 = vpop.xlane.xlu0 %144 }
 0x18d   :  { %v154_v19 = vmul.f32 0.0078125, %v149_v16  ;;  %v152_v20 = vmul.f32 0.0078125, %v145_v17  ;;  %v159_v21 = vmul.f32 %v155_v15, %v155_v15  ;;  %v161_v24 = vmul.f32 %v157_v18, %v157_v18 }
 0x18f   :  { %v156_v22 = vsub.f32 %v300_v3, %v152_v20  ;;  %163 = vadd.xlane.f32.xlu0 %v159_v21  ;;  %v158_v23 = vsub.f32 %v306_v4, %v154_v19 }
 0x190   :  { %v199_v29 = vpop.permute.xlu1 %198 }
 0x191   :  { %v160_v25 = vmul.f32 %v156_v22, %v156_v22  ;;  %v162_v26 = vmul.f32 %v158_v23, %v158_v23 }
 0x193   :  { %167 = vadd.xlane.f32.xlu0 %v161_v24  ;;  %165 = vadd.xlane.f32.xlu1 %v160_v25 }
 0x194   :  { %v204_v30 = vpop.permute.xlu1 %203 }
 0x197   :  { %169 = vadd.xlane.f32.xlu1 %v162_v26 }
 0x198   :  { %v209_v31 = vpop.permute.xlu1 %208 }
 0x19c   :  { %v222_v32 = vpop.permute.xlu1 %221 }
 0x1a0   :  { %v227_v33 = vpop.permute.xlu1 %226 }
 0x1a4   :  { %v232_v34 = vpop.permute.xlu1 %231 }
 0x1a8   :  { %236 = vperm.xlu1 %357, %v218_v27  }
 0x1a9   :  { %193 = vperm.xlu0 %356, %v187_v28  }
 0x21c   :  { %v164_v35 = vpop.xlane.xlu0 %163 }
 0x21d   :  { %v171_v36 = vmul.f32 0.0078125, %v164_v35 }
 0x21f   :  { %v175_v37 = vadd.f32 1e-05, %v171_v36 }
 0x220   :  { %v166_v38 = vpop.xlane.xlu1 %165  ;;  %v168_v39 = vpop.xlane.xlu0 %167 }
 0x221   :  { %358 = vrsqrt.f32 %v175_v37  ;;  %v172_v40 = vmul.f32 0.0078125, %v166_v38  ;;  %v173_v41 = vmul.f32 0.0078125, %v168_v39 }
 0x223   :  { %v176_v42 = vadd.f32 1e-05, %v172_v40  ;;  %v177_v43 = vadd.f32 1e-05, %v173_v41 }
 0x224   :  { %v170_v44 = vpop.xlane.xlu1 %169 }
 0x225   :  { %360 = vrsqrt.f32 %v176_v42  ;;  %v174_v45 = vmul.f32 0.0078125, %v170_v44 }
 0x226   :  { %362 = vrsqrt.f32 %v177_v43 }
 0x227   :  { %v178_v46 = vadd.f32 1e-05, %v174_v45 }
 0x228   :  { %v194_v48 = vpop.permute.xlu0 %193  ;;  %v237_v2 = vpop.permute.xlu1 %236 }
 0x229   :  { %364 = vrsqrt.f32 %v178_v46 }
 0x22b   :  { %v359_v47 = vpop.eup %358 }
 0x22c   :  { %v183_v49 = vmul.f32 %v359_v47, %v155_v15 }
 0x22e   :  { %v211_v50 = vmul.f32 %v194_v48, %v183_v49 }
 0x22f   :  { %v361_v51 = vpop.eup %360 }
 0x230   :  { %v363_v52 = vpop.eup %362  ;;  %v184_v53 = vmul.f32 %v361_v51, %v156_v22  ;;  %v239_v54 = vadd.f32 %v222_v32, %v211_v50 }
 0x231   :  { %v185_v55 = vmul.f32 %v363_v52, %v157_v18 }
 0x232   :  { %v212_v56 = vmul.f32 %v199_v29, %v184_v53  ;;  %vm243_vm0 = vcmp.gt.f32.partialorder %v239_v54, 0.0  ;;  %v247_v57 = vmul.f32 0.2, %v239_v54 }
 0x233   :  { %v365_v58 = vpop.eup %364  ;;  %v213_v59 = vmul.f32 %v204_v30, %v185_v55 }
 0x234   :  { %v240_v60 = vadd.f32 %v227_v33, %v212_v56  ;;  %v186_v61 = vmul.f32 %v365_v58, %v158_v23  ;;  %v251_v62 = vsel %vm243_vm0, %v239_v54, %v247_v57 }
 0x235   :  { %v241_v63 = vadd.f32 %v232_v34, %v213_v59  ;;  %255 = vst [vmem:[%s552_s4] sm:$0xff] %v251_v62 }
 0x236   :  { %v214_v0 = vmul.f32 %v209_v31, %v186_v61  ;;  %vm244_vm1 = vcmp.gt.f32.partialorder %v240_v60, 0.0  ;;  %v248_v1 = vmul.f32 0.2, %v240_v60 }
 0x237   :  { %vm245_vm2 = vcmp.gt.f32.partialorder %v241_v63, 0.0  ;;  %v249_v3 = vmul.f32 0.2, %v241_v63 }
 0x238   :  { %v252_v4 = vsel %vm244_vm1, %v240_v60, %v248_v1  ;;  %v242_v5 = vadd.f32 %v237_v2, %v214_v0 }
 0x239   :  { %256 = vst [vmem:[%s552_s4 + $0x8] sm:$0xff] %v252_v4  ;;  %v253_v6 = vsel %vm245_vm2, %v241_v63, %v249_v3 }
 0x23a   :  { %vm246_vm3 = vcmp.gt.f32.partialorder %v242_v5, 0.0  ;;  %v250_v7 = vmul.f32 0.2, %v242_v5  ;;  %257 = vst [vmem:[%s552_s4 + $0x10] sm:$0xff] %v253_v6 }
 0x23c   :  { %v254_v8 = vsel %vm246_vm3, %v242_v5, %v250_v7 }
 0x23d   :  { %258 = vst [vmem:[%s552_s4 + $0x18] sm:$0xff] %v254_v8 }

// kernel: discriminator_forward.7
= control target key start
LH: loop header
LB: loop body
LE: loop exit
PB: predicated region body
PF: predicated region fallthrough
CT: control target
= control target key end

     0   :  { %vm329_vm0 = vcmask 261120   ;;  %vm610_vm9 = vcmask 254976   ;;  %vm620_vm10 = vcmask 1024   ;;  %s1347_s1 = inlined_call_operand.vmem [shape: f32[512,32], index: 1, kind: input, shape index: {}]   ;;  %s1348_s0 = inlined_call_operand.vmem [shape: f32[64,512], index: 0, kind: input, shape index: {}]   ;;  %s1349_s2 = inlined_call_operand.vmem [shape: f32[64,1], index: 2, kind: input, shape index: {}]   ;;  %s1350_s3 = inlined_call_operand.vmem [shape: f32[64,1], index: 3, kind: input, shape index: {}]   ;;  %s1351_s4 = inlined_call_operand.vmem [shape: f32[64,32], index: 4, kind: input, shape index: {}]   ;;  %s1352_s5 = inlined_call_operand.vmem [shape: f32[2,32], index: 5, kind: input, shape index: {}]   ;;  %s1353_s6 = inlined_call_operand.vmem [shape: f32[2,1], index: 6, kind: output, shape index: {}]  }
   0x1   :  { %v71_v0 = vld [vmem:[%s1347_s1 + $0x80] sm:$0xff]  ;;  %v72_v1 = vld [vmem:[%s1347_s1 + $0x88] sm:$0xff]  ;;  %v73_v11 = vld [vmem:[%s1347_s1 + $0x90] sm:$0xff] }
   0x2   :  { %v103_v2 = vld [vmem:[%s1347_s1 + $0x180] sm:$0xff]  ;;  %v738_v3 = vpack.c.bf16 %v72_v1, %v71_v0  ;;  %v104_v4 = vld [vmem:[%s1347_s1 + $0x188] sm:$0xff]  ;;  %v74_v13 = vld [vmem:[%s1347_s1 + $0x98] sm:$0xff] }
   0x3   :  { %v55_v5 = vld [vmem:[%s1347_s1] sm:$0xff]  ;;  %v56_v6 = vld [vmem:[%s1347_s1 + $0x8] sm:$0xff]  ;;  %v770_v7 = vpack.c.bf16 %v104_v4, %v103_v2  ;;  %v105_v14 = vld [vmem:[%s1347_s1 + $0x190] sm:$0xff]  ;;  %v742_v16 = vpack.c.bf16 %v74_v13, %v73_v11 }
   0x4   :  { %v740_v8 = vpack.c.bf16 %v56_v6, %v55_v5  ;;  %v87_v9 = vld [vmem:[%s1347_s1 + $0x100] sm:$0xff]  ;;  %v88_v10 = vld [vmem:[%s1347_s1 + $0x108] sm:$0xff]  ;;  %739 = vmatprep.subr.bf16.mxu0 %v738_v3  ;;  %v106_v15 = vld [vmem:[%s1347_s1 + $0x198] sm:$0xff] }
   0x5   :  { %v772_v12 = vpack.c.bf16 %v88_v10, %v87_v9  ;;  %771 = vmatprep.subr.bf16.mxu1 %v770_v7  ;;  %v774_v17 = vpack.c.bf16 %v106_v15, %v105_v14  ;;  %v57_v18 = vld [vmem:[%s1347_s1 + $0x10] sm:$0xff]  ;;  %v58_v19 = vld [vmem:[%s1347_s1 + $0x18] sm:$0xff]  ;;  %v75_v23 = vld [vmem:[%s1347_s1 + $0xa0] sm:$0xff] }
   0x6   :  { %741 = vmatpush3.bf16.msra.mxu0 %v740_v8  ;;  %v89_v20 = vld [vmem:[%s1347_s1 + $0x110] sm:$0xff]  ;;  %v744_v21 = vpack.c.bf16 %v58_v19, %v57_v18  ;;  %v90_v22 = vld [vmem:[%s1347_s1 + $0x118] sm:$0xff]  ;;  %v76_v24 = vld [vmem:[%s1347_s1 + $0xa8] sm:$0xff] }
   0x7   :  { %773 = vmatpush3.bf16.msra.mxu1 %v772_v12  ;;  %743 = vmatprep.subr.bf16.mxu0 %v742_v16  ;;  %v776_v25 = vpack.c.bf16 %v90_v22, %v89_v20  ;;  %v746_v26 = vpack.c.bf16 %v76_v24, %v75_v23  ;;  %v107_v27 = vld [vmem:[%s1347_s1 + $0x1a0] sm:$0xff]  ;;  %v108_v28 = vld [vmem:[%s1347_s1 + $0x1a8] sm:$0xff]  ;;  %v77_v35 = vld [vmem:[%s1347_s1 + $0xb0] sm:$0xff] }
   0x8   :  { %775 = vmatprep.subr.bf16.mxu1 %v774_v17  ;;  %v59_v29 = vld [vmem:[%s1347_s1 + $0x20] sm:$0xff]  ;;  %v778_v30 = vpack.c.bf16 %v108_v28, %v107_v27  ;;  %v60_v31 = vld [vmem:[%s1347_s1 + $0x28] sm:$0xff]  ;;  %v78_v36 = vld [vmem:[%s1347_s1 + $0xb8] sm:$0xff] }
   0x9   :  { %v91_v32 = vld [vmem:[%s1347_s1 + $0x120] sm:$0xff]  ;;  %v92_v33 = vld [vmem:[%s1347_s1 + $0x128] sm:$0xff]  ;;  %v748_v34 = vpack.c.bf16 %v60_v31, %v59_v29  ;;  %v109_v37 = vld [vmem:[%s1347_s1 + $0x1b0] sm:$0xff]  ;;  %v750_v39 = vpack.c.bf16 %v78_v36, %v77_v35 }
   0xa   :  { %745 = vmatpush3.bf16.msra.mxu0 %v744_v21  ;;  %v780_v38 = vpack.c.bf16 %v92_v33, %v91_v32  ;;  %v110_v40 = vld [vmem:[%s1347_s1 + $0x1b8] sm:$0xff]  ;;  %v61_v41 = vld [vmem:[%s1347_s1 + $0x30] sm:$0xff]  ;;  %v79_v46 = vld [vmem:[%s1347_s1 + $0xc0] sm:$0xff] }
   0xb   :  { %777 = vmatpush3.bf16.msra.mxu1 %v776_v25  ;;  %747 = vmatprep.subr.bf16.mxu0 %v746_v26  ;;  %v62_v42 = vld [vmem:[%s1347_s1 + $0x38] sm:$0xff]  ;;  %v782_v43 = vpack.c.bf16 %v110_v40, %v109_v37  ;;  %v93_v44 = vld [vmem:[%s1347_s1 + $0x130] sm:$0xff]  ;;  %v80_v47 = vld [vmem:[%s1347_s1 + $0xc8] sm:$0xff] }
   0xc   :  { %779 = vmatprep.subr.bf16.mxu1 %v778_v30  ;;  %v94_v45 = vld [vmem:[%s1347_s1 + $0x138] sm:$0xff]  ;;  %v111_v48 = vld [vmem:[%s1347_s1 + $0x1c0] sm:$0xff]  ;;  %v112_v49 = vld [vmem:[%s1347_s1 + $0x1c8] sm:$0xff]  ;;  %v752_v50 = vpack.c.bf16 %v62_v42, %v61_v41  ;;  %v754_v52 = vpack.c.bf16 %v80_v47, %v79_v46 }
   0xd   :  { %v784_v51 = vpack.c.bf16 %v94_v45, %v93_v44  ;;  %v63_v53 = vld [vmem:[%s1347_s1 + $0x40] sm:$0xff]  ;;  %v64_v54 = vld [vmem:[%s1347_s1 + $0x48] sm:$0xff]  ;;  %v786_v56 = vpack.c.bf16 %v112_v49, %v111_v48  ;;  %v81_v58 = vld [vmem:[%s1347_s1 + $0xd0] sm:$0xff] }
   0xe   :  { %749 = vmatpush3.bf16.msra.mxu0 %v748_v34  ;;  %v95_v55 = vld [vmem:[%s1347_s1 + $0x140] sm:$0xff]  ;;  %v96_v57 = vld [vmem:[%s1347_s1 + $0x148] sm:$0xff]  ;;  %v82_v59 = vld [vmem:[%s1347_s1 + $0xd8] sm:$0xff]  ;;  %v756_v62 = vpack.c.bf16 %v64_v54, %v63_v53 }
   0xf   :  { %781 = vmatpush3.bf16.msra.mxu1 %v780_v38  ;;  %751 = vmatprep.subr.bf16.mxu0 %v750_v39  ;;  %v113_v60 = vld [vmem:[%s1347_s1 + $0x1d0] sm:$0xff]  ;;  %v114_v61 = vld [vmem:[%s1347_s1 + $0x1d8] sm:$0xff]  ;;  %v788_v63 = vpack.c.bf16 %v96_v57, %v95_v55  ;;  %v758_v0 = vpack.c.bf16 %v82_v59, %v81_v58  ;;  %v83_v6 = vld [vmem:[%s1347_s1 + $0xe0] sm:$0xff] }
  0x10   :  { %783 = vmatprep.subr.bf16.mxu1 %v782_v43  ;;  %v65_v1 = vld [vmem:[%s1347_s1 + $0x50] sm:$0xff]  ;;  %v66_v2 = vld [vmem:[%s1347_s1 + $0x58] sm:$0xff]  ;;  %v790_v4 = vpack.c.bf16 %v114_v61, %v113_v60  ;;  %v84_v7 = vld [vmem:[%s1347_s1 + $0xe8] sm:$0xff] }
  0x11   :  { %v97_v3 = vld [vmem:[%s1347_s1 + $0x150] sm:$0xff]  ;;  %v98_v5 = vld [vmem:[%s1347_s1 + $0x158] sm:$0xff]  ;;  %v115_v8 = vld [vmem:[%s1347_s1 + $0x1e0] sm:$0xff]  ;;  %v760_v10 = vpack.c.bf16 %v66_v2, %v65_v1  ;;  %v762_v14 = vpack.c.bf16 %v84_v7, %v83_v6 }
  0x12   :  { %753 = vmatpush3.bf16.msra.mxu0 %v752_v50  ;;  %v116_v9 = vld [vmem:[%s1347_s1 + $0x1e8] sm:$0xff]  ;;  %v67_v11 = vld [vmem:[%s1347_s1 + $0x60] sm:$0xff]  ;;  %v792_v13 = vpack.c.bf16 %v98_v5, %v97_v3  ;;  %v26_v17 = vld [vmem:[%s1348_s0 + $0x18] sm:$0xff] }
  0x13   :  { %785 = vmatpush3.bf16.msra.mxu1 %v784_v51  ;;  %755 = vmatprep.subr.bf16.mxu0 %v754_v52  ;;  %v68_v12 = vld [vmem:[%s1347_s1 + $0x68] sm:$0xff]  ;;  %v99_v15 = vld [vmem:[%s1347_s1 + $0x160] sm:$0xff]  ;;  %v794_v18 = vpack.c.bf16 %v116_v9, %v115_v8  ;;  %v85_v20 = vld [vmem:[%s1347_s1 + $0xf0] sm:$0xff] }
  0x14   :  { %787 = vmatprep.subr.bf16.mxu1 %v786_v56  ;;  %v24_v16 = vld [vmem:[%s1348_s0 + $0x8] sm:$0xff]  ;;  %v86_v21 = vld [vmem:[%s1347_s1 + $0xf8] sm:$0xff]  ;;  %v117_v22 = vld [vmem:[%s1347_s1 + $0x1f0] sm:$0xff]  ;;  %288 = vmatprep.mubr.f32.mxu1 %v26_v17  ;;  %v764_v24 = vpack.c.bf16 %v68_v12, %v67_v11 }
  0x15   :  { %v100_v19 = vld [vmem:[%s1347_s1 + $0x168] sm:$0xff]  ;;  %183 = vmatprep.mubr.f32.mxu0 %v24_v16  ;;  %v118_v23 = vld [vmem:[%s1347_s1 + $0x1f8] sm:$0xff]  ;;  %v766_v26 = vpack.c.bf16 %v86_v21, %v85_v20  ;;  %v69_v27 = vld [vmem:[%s1347_s1 + $0x70] sm:$0xff] }
  0x16   :  { %757 = vmatpush3.bf16.msra.mxu0 %v756_v62  ;;  %v796_v25 = vpack.c.bf16 %v100_v19, %v99_v15  ;;  %v70_v28 = vld [vmem:[%s1347_s1 + $0x78] sm:$0xff]  ;;  %v798_v29 = vpack.c.bf16 %v118_v23, %v117_v22  ;;  %v101_v30 = vld [vmem:[%s1347_s1 + $0x170] sm:$0xff]  ;;  %v23_v34 = vld [vmem:[%s1348_s0] sm:$0xff] }
  0x17   :  { %789 = vmatpush3.bf16.msra.mxu1 %v788_v63  ;;  %759 = vmatprep.subr.bf16.mxu0 %v758_v0  ;;  %v102_v31 = vld [vmem:[%s1347_s1 + $0x178] sm:$0xff]  ;;  %v768_v32 = vpack.c.bf16 %v70_v28, %v69_v27  ;;  %v25_v35 = vld [vmem:[%s1348_s0 + $0x10] sm:$0xff]  ;;  %v28_v36 = vld [vmem:[%s1348_s0 + $0x28] sm:$0xff]  ;;  %v825_v0 = vmov 0  }
  0x18   :  { %791 = vmatprep.subr.bf16.mxu1 %v790_v4  ;;  %v800_v33 = vpack.c.bf16 %v102_v31, %v101_v30  ;;  %v30_v37 = vld [vmem:[%s1348_s0 + $0x38] sm:$0xff]  ;;  %v27_v38 = vld [vmem:[%s1348_s0 + $0x20] sm:$0xff]  ;;  %v29_v39 = vld [vmem:[%s1348_s0 + $0x30] sm:$0xff]  ;;  %804 = vset.pattern.permute.xlu1 %v825_v0 }
  0x19   :  { %v32_v40 = vld [vmem:[%s1348_s0 + $0x48] sm:$0xff]  ;;  %v34_v41 = vld [vmem:[%s1348_s0 + $0x58] sm:$0xff]  ;;  %v31_v42 = vld [vmem:[%s1348_s0 + $0x40] sm:$0xff]  ;;  %803 = vset.pattern.permute.xlu0 %v825_v0 }
  0x1a   :  { %761 = vmatpush3.bf16.msra.mxu0 %v760_v10  ;;  %v33_v43 = vld [vmem:[%s1348_s0 + $0x50] sm:$0xff]  ;;  %v36_v44 = vld [vmem:[%s1348_s0 + $0x68] sm:$0xff]  ;;  %v38_v45 = vld [vmem:[%s1348_s0 + $0x78] sm:$0xff] }
  0x1b   :  { %793 = vmatpush3.bf16.msra.mxu1 %v792_v13  ;;  %763 = vmatprep.subr.bf16.mxu0 %v762_v14  ;;  %v35_v46 = vld [vmem:[%s1348_s0 + $0x60] sm:$0xff]  ;;  %v37_v47 = vld [vmem:[%s1348_s0 + $0x70] sm:$0xff]  ;;  %v40_v48 = vld [vmem:[%s1348_s0 + $0x88] sm:$0xff] }
  0x1c   :  { %795 = vmatprep.subr.bf16.mxu1 %v794_v18  ;;  %v42_v49 = vld [vmem:[%s1348_s0 + $0x98] sm:$0xff]  ;;  %v39_v50 = vld [vmem:[%s1348_s0 + $0x80] sm:$0xff]  ;;  %v41_v51 = vld [vmem:[%s1348_s0 + $0x90] sm:$0xff] }
  0x1d   :  { %v44_v52 = vld [vmem:[%s1348_s0 + $0xa8] sm:$0xff]  ;;  %v46_v53 = vld [vmem:[%s1348_s0 + $0xb8] sm:$0xff]  ;;  %v43_v54 = vld [vmem:[%s1348_s0 + $0xa0] sm:$0xff] }
  0x1e   :  { %765 = vmatpush3.bf16.msra.mxu0 %v764_v24  ;;  %v45_v55 = vld [vmem:[%s1348_s0 + $0xb0] sm:$0xff]  ;;  %v48_v56 = vld [vmem:[%s1348_s0 + $0xc8] sm:$0xff]  ;;  %v50_v57 = vld [vmem:[%s1348_s0 + $0xd8] sm:$0xff] }
  0x1f   :  { %797 = vmatpush3.bf16.msra.mxu1 %v796_v25  ;;  %767 = vmatprep.subr.bf16.mxu0 %v766_v26  ;;  %v47_v58 = vld [vmem:[%s1348_s0 + $0xc0] sm:$0xff]  ;;  %v49_v59 = vld [vmem:[%s1348_s0 + $0xd0] sm:$0xff]  ;;  %v52_v60 = vld [vmem:[%s1348_s0 + $0xe8] sm:$0xff] }
  0x20   :  { %799 = vmatprep.subr.bf16.mxu1 %v798_v29  ;;  %v54_v61 = vld [vmem:[%s1348_s0 + $0xf8] sm:$0xff]  ;;  %v51_v62 = vld [vmem:[%s1348_s0 + $0xe0] sm:$0xff]  ;;  %v53_v63 = vld [vmem:[%s1348_s0 + $0xf0] sm:$0xff] }
  0x21   :  { %v436_v0 = vld [vmem:[%s1349_s2 + $0x8] sm:$0xff] }
  0x22   :  { %769 = vmatpush3.bf16.msra.mxu0 %v768_v32 }
  0x23   :  { %801 = vmatpush3.bf16.msra.mxu1 %v800_v33 }
  0x25   :  { %184 = vmatmul.mubr.f32.vlgmr.msra.gmra.mrb[0].mxu0 %v23_v34 }
  0x26   :  { %289 = vmatmul.mubr.f32.vlgmr.msra.gmra.mrb[0].mxu1 %v25_v35  ;;  %188 = vmatprep.mubr.f32.mxu0 %v28_v36 }
  0x27   :  { %293 = vmatprep.mubr.f32.mxu1 %v30_v37 }
  0x29   :  { %189 = vmatmul.mubr.f32.gmra.mrb[2].mxu0 %v27_v38 }
  0x2a   :  { %294 = vmatmul.mubr.f32.gmra.mrb[2].mxu1 %v29_v39  ;;  %193 = vmatprep.mubr.f32.mxu0 %v32_v40 }
  0x2b   :  { %298 = vmatprep.mubr.f32.mxu1 %v34_v41 }
  0x2d   :  { %194 = vmatmul.mubr.f32.gmra.mrb[4].mxu0 %v31_v42 }
  0x2e   :  { %299 = vmatmul.mubr.f32.gmra.mrb[4].mxu1 %v33_v43  ;;  %198 = vmatprep.mubr.f32.mxu0 %v36_v44 }
  0x2f   :  { %303 = vmatprep.mubr.f32.mxu1 %v38_v45 }
  0x31   :  { %199 = vmatmul.mubr.f32.gmra.mrb[6].mxu0 %v35_v46 }
  0x32   :  { %304 = vmatmul.mubr.f32.gmra.mrb[6].mxu1 %v37_v47  ;;  %203 = vmatprep.mubr.f32.mxu0 %v40_v48 }
  0x33   :  { %308 = vmatprep.mubr.f32.mxu1 %v42_v49 }
  0x35   :  { %204 = vmatmul.mubr.f32.gmra.mrb[8].mxu0 %v39_v50 }
  0x36   :  { %309 = vmatmul.mubr.f32.gmra.mrb[8].mxu1 %v41_v51  ;;  %208 = vmatprep.mubr.f32.mxu0 %v44_v52 }
  0x37   :  { %313 = vmatprep.mubr.f32.mxu1 %v46_v53 }
  0x39   :  { %209 = vmatmul.mubr.f32.gmra.mrb[10].mxu0 %v43_v54 }
  0x3a   :  { %314 = vmatmul.mubr.f32.gmra.mrb[10].mxu1 %v45_v55  ;;  %213 = vmatprep.mubr.f32.mxu0 %v48_v56 }
  0x3b   :  { %318 = vmatprep.mubr.f32.mxu1 %v50_v57 }
  0x3d   :  { %214 = vmatmul.mubr.f32.gmra.mrb[12].mxu0 %v47_v58 }
  0x3e   :  { %319 = vmatmul.mubr.f32.gmra.mrb[12].mxu1 %v49_v59  ;;  %218 = vmatprep.mubr.f32.mxu0 %v52_v60 }
  0x3f   :  { %323 = vmatprep.mubr.f32.mxu1 %v54_v61 }
  0x41   :  { %219 = vmatmul.mubr.f32.gmra.mrb[14].mxu0 %v51_v62 }
  0x42   :  { %324 = vmatmul.mubr.f32.gmra.mrb[14].mxu1 %v53_v63 }
  0xf8   :  { %v658_v1 = vpop.f32.mrb[0].mxu0 }
  0xf9   :  { %v714_v2 = vpop.f32.mrb[0].mxu1  ;;  %v659_v3 = vpop.f32.mrb[1].mxu0 }
  0xfa   :  { %v660_v4 = vadd.f32 %v659_v3, %v658_v1  ;;  %v715_v5 = vpop.f32.mrb[1].mxu1  ;;  %v437_v1 = vld [vmem:[%s1349_s2 + $0x10] sm:$0xff]  ;;  %v435_v3 = vld [vmem:[%s1349_s2] sm:$0xff] }
  0xfb   :  { %v716_v6 = vadd.f32 %v715_v5, %v714_v2  ;;  %v491_v2 = vld [vmem:[%s1350_s3] sm:$0xff]  ;;  %v440_v5 = vld [vmem:[%s1349_s2 + $0x28] sm:$0xff] }
  0xfc   :  { %v661_v7 = vpop.f32.mrb[2].mxu0 }
  0xfd   :  { %v717_v8 = vpop.f32.mrb[2].mxu1  ;;  %v662_v9 = vpop.f32.mrb[3].mxu0  ;;  %v1149_v10 = vadd.f32 %v716_v6, %v660_v4  ;;  %v492_v4 = vld [vmem:[%s1350_s3 + $0x8] sm:$0xff]  ;;  %v438_v6 = vld [vmem:[%s1349_s2 + $0x18] sm:$0xff] }
  0xfe   :  { %v663_v11 = vadd.f32 %v662_v9, %v661_v7  ;;  %v718_v12 = vpop.f32.mrb[3].mxu1  ;;  %v441_v7 = vld [vmem:[%s1349_s2 + $0x30] sm:$0xff]  ;;  %v442_v9 = vld [vmem:[%s1349_s2 + $0x38] sm:$0xff] }
  0xff   :  { %v719_v13 = vadd.f32 %v718_v12, %v717_v8  ;;  %v330_v14 = vsel %vm329_vm0, %v1149_v10, 0.0  ;;  %v493_v8 = vld [vmem:[%s1350_s3 + $0x10] sm:$0xff]  ;;  %v494_v12 = vld [vmem:[%s1350_s3 + $0x18] sm:$0xff] }
 0x100   :  { %331 = vadd.xlane.f32.xlu0 %v330_v14  ;;  %v664_v15 = vpop.f32.mrb[4].mxu0  ;;  %v495_v14 = vld [vmem:[%s1350_s3 + $0x20] sm:$0xff] }
 0x101   :  { %v720_v16 = vpop.f32.mrb[4].mxu1  ;;  %v665_v17 = vpop.f32.mrb[5].mxu0  ;;  %v1153_v18 = vadd.f32 %v719_v13, %v663_v11  ;;  %v439_v11 = vld [vmem:[%s1349_s2 + $0x20] sm:$0xff] }
 0x102   :  { %v666_v19 = vadd.f32 %v665_v17, %v664_v15  ;;  %v721_v20 = vpop.f32.mrb[5].mxu1  ;;  %v496_v15 = vld [vmem:[%s1350_s3 + $0x28] sm:$0xff] }
 0x103   :  { %v722_v21 = vadd.f32 %v721_v20, %v720_v16  ;;  %v333_v22 = vsel %vm329_vm0, %v1153_v18, 0.0 }
 0x104   :  { %334 = vadd.xlane.f32.xlu0 %v333_v22  ;;  %v667_v23 = vpop.f32.mrb[6].mxu0 }
 0x105   :  { %v723_v24 = vpop.f32.mrb[6].mxu1  ;;  %v668_v25 = vpop.f32.mrb[7].mxu0  ;;  %v1157_v26 = vadd.f32 %v722_v21, %v666_v19 }
 0x106   :  { %v669_v27 = vadd.f32 %v668_v25, %v667_v23  ;;  %v724_v28 = vpop.f32.mrb[7].mxu1 }
 0x107   :  { %v725_v29 = vadd.f32 %v724_v28, %v723_v24  ;;  %v336_v30 = vsel %vm329_vm0, %v1157_v26, 0.0 }
 0x108   :  { %337 = vadd.xlane.f32.xlu1 %v336_v30  ;;  %v670_v31 = vpop.f32.mrb[8].mxu0 }
 0x109   :  { %v726_v32 = vpop.f32.mrb[8].mxu1  ;;  %v671_v33 = vpop.f32.mrb[9].mxu0  ;;  %v1161_v34 = vadd.f32 %v725_v29, %v669_v27 }
 0x10a   :  { %v672_v35 = vadd.f32 %v671_v33, %v670_v31  ;;  %v727_v36 = vpop.f32.mrb[9].mxu1 }
 0x10b   :  { %v728_v37 = vadd.f32 %v727_v36, %v726_v32  ;;  %v339_v38 = vsel %vm329_vm0, %v1161_v34, 0.0 }
 0x10c   :  { %340 = vadd.xlane.f32.xlu1 %v339_v38  ;;  %v673_v39 = vpop.f32.mrb[10].mxu0 }
 0x10d   :  { %v729_v40 = vpop.f32.mrb[10].mxu1  ;;  %v674_v41 = vpop.f32.mrb[11].mxu0  ;;  %v1165_v42 = vadd.f32 %v728_v37, %v672_v35 }
 0x10e   :  { %v675_v43 = vadd.f32 %v674_v41, %v673_v39  ;;  %v730_v44 = vpop.f32.mrb[11].mxu1 }
 0x10f   :  { %v731_v45 = vadd.f32 %v730_v44, %v729_v40  ;;  %v342_v46 = vsel %vm329_vm0, %v1165_v42, 0.0 }
 0x110   :  { %343 = vadd.xlane.f32.xlu0 %v342_v46  ;;  %v676_v47 = vpop.f32.mrb[12].mxu0 }
 0x111   :  { %v732_v48 = vpop.f32.mrb[12].mxu1  ;;  %v677_v49 = vpop.f32.mrb[13].mxu0  ;;  %v1169_v50 = vadd.f32 %v731_v45, %v675_v43 }
 0x112   :  { %v678_v51 = vadd.f32 %v677_v49, %v676_v47  ;;  %v733_v52 = vpop.f32.mrb[13].mxu1 }
 0x113   :  { %v734_v53 = vadd.f32 %v733_v52, %v732_v48  ;;  %v345_v54 = vsel %vm329_vm0, %v1169_v50, 0.0 }
 0x114   :  { %346 = vadd.xlane.f32.xlu1 %v345_v54  ;;  %v679_v55 = vpop.f32.mrb[14].mxu0 }
 0x115   :  { %v1173_v56 = vadd.f32 %v734_v53, %v678_v51  ;;  %v735_v57 = vpop.f32.mrb[14].mxu1  ;;  %v680_v58 = vpop.f32.mrb[15].mxu0 }
 0x116   :  { %v681_v59 = vadd.f32 %v680_v58, %v679_v55  ;;  %v736_v60 = vpop.f32.mrb[15].mxu1 }
 0x117   :  { %v348_v61 = vsel %vm329_vm0, %v1173_v56, 0.0  ;;  %v737_v62 = vadd.f32 %v736_v60, %v735_v57 }
 0x118   :  { %349 = vadd.xlane.f32.xlu0 %v348_v61 }
 0x119   :  { %v1177_v63 = vadd.f32 %v737_v62, %v681_v59 }
 0x11b   :  { %v351_v13 = vsel %vm329_vm0, %v1177_v63, 0.0 }
 0x125   :  { %450 = vperm.xlu1 %804, %v436_v0  }
 0x129   :  { %455 = vperm.xlu1 %804, %v437_v1   ;;  %v497_v1 = vld [vmem:[%s1350_s3 + $0x30] sm:$0xff] }
 0x12d   :  { %501 = vperm.xlu1 %804, %v491_v2  }
 0x12e   :  { %445 = vperm.xlu0 %803, %v435_v3  }
 0x131   :  { %506 = vperm.xlu1 %804, %v492_v4  }
 0x132   :  { %470 = vperm.xlu0 %803, %v440_v5  }
 0x135   :  { %460 = vperm.xlu1 %804, %v438_v6  }
 0x136   :  { %475 = vperm.xlu0 %803, %v441_v7  }
 0x139   :  { %511 = vperm.xlu1 %804, %v493_v8  }
 0x13a   :  { %480 = vperm.xlu0 %803, %v442_v9  }
 0x13d   :  { %465 = vperm.xlu1 %804, %v439_v11  }
 0x141   :  { %516 = vperm.xlu1 %804, %v494_v12  }
 0x165   :  { %352 = vadd.xlane.f32.xlu1 %v351_v13 }
 0x176   :  { %521 = vperm.xlu1 %804, %v495_v14  }
 0x17a   :  { %526 = vperm.xlu1 %804, %v496_v15  }
 0x18d   :  { %v332_v16 = vpop.xlane.xlu0 %331 }
 0x18e   :  { %v355_v17 = vmul.f32 0.03125, %v332_v16 }
 0x190   :  { %v1224_v19 = vsub.f32 %v1149_v10, %v355_v17 }
 0x191   :  { %v335_v20 = vpop.xlane.xlu0 %334 }
 0x192   :  { %v356_v21 = vmul.f32 0.03125, %v335_v20  ;;  %v371_v22 = vmul.f32 %v1224_v19, %v1224_v19 }
 0x194   :  { %v379_v23 = vsel %vm329_vm0, %v371_v22, 0.0  ;;  %v1230_v24 = vsub.f32 %v1153_v18, %v356_v21 }
 0x195   :  { %v338_v25 = vpop.xlane.xlu1 %337  ;;  %380 = vadd.xlane.f32.xlu0 %v379_v23 }
 0x196   :  { %v357_v27 = vmul.f32 0.03125, %v338_v25  ;;  %v372_v10 = vmul.f32 %v1230_v24, %v1230_v24 }
 0x198   :  { %v1233_v28 = vsub.f32 %v1157_v26, %v357_v27  ;;  %v382_v35 = vsel %vm329_vm0, %v372_v10, 0.0 }
 0x199   :  { %v341_v29 = vpop.xlane.xlu1 %340 }
 0x19a   :  { %v358_v30 = vmul.f32 0.03125, %v341_v29  ;;  %v373_v31 = vmul.f32 %v1233_v28, %v1233_v28 }
 0x19c   :  { %v1240_v32 = vsub.f32 %v1161_v34, %v358_v30  ;;  %v385_v18 = vsel %vm329_vm0, %v373_v31, 0.0 }
 0x19d   :  { %386 = vadd.xlane.f32.xlu0 %v385_v18  ;;  %v344_v33 = vpop.xlane.xlu0 %343 }
 0x19e   :  { %v359_v36 = vmul.f32 0.03125, %v344_v33  ;;  %383 = vadd.xlane.f32.xlu1 %v382_v35  ;;  %v374_v26 = vmul.f32 %v1240_v32, %v1240_v32 }
 0x1a0   :  { %v1247_v37 = vsub.f32 %v1165_v42, %v359_v36  ;;  %v388_v38 = vsel %vm329_vm0, %v374_v26, 0.0 }
 0x1a1   :  { %v347_v39 = vpop.xlane.xlu1 %346 }
 0x1a2   :  { %v360_v40 = vmul.f32 0.03125, %v347_v39  ;;  %389 = vadd.xlane.f32.xlu1 %v388_v38  ;;  %v375_v34 = vmul.f32 %v1247_v37, %v1247_v37 }
 0x1a4   :  { %v1253_v41 = vsub.f32 %v1169_v50, %v360_v40  ;;  %v391_v43 = vsel %vm329_vm0, %v375_v34, 0.0  ;;  %v498_v50 = vld [vmem:[%s1350_s3 + $0x38] sm:$0xff] }
 0x1a5   :  { %392 = vadd.xlane.f32.xlu0 %v391_v43  ;;  %v350_v44 = vpop.xlane.xlu0 %349  ;;  %v451_v51 = vpop.permute.xlu1 %450 }
 0x1a6   :  { %v361_v45 = vmul.f32 0.03125, %v350_v44  ;;  %v376_v42 = vmul.f32 %v1253_v41, %v1253_v41 }
 0x1a8   :  { %v1259_v46 = vsub.f32 %v1173_v56, %v361_v45  ;;  %v394_v47 = vsel %vm329_vm0, %v376_v42, 0.0 }
 0x1a9   :  { %395 = vadd.xlane.f32.xlu1 %v394_v47  ;;  %v456_v52 = vpop.permute.xlu1 %455 }
 0x1aa   :  { %v377_v48 = vmul.f32 %v1259_v46, %v1259_v46 }
 0x1ac   :  { %v397_v49 = vsel %vm329_vm0, %v377_v48, 0.0 }
 0x1ad   :  { %398 = vadd.xlane.f32.xlu0 %v397_v49  ;;  %v502_v53 = vpop.permute.xlu1 %501  ;;  %v446_v2 = vpop.permute.xlu0 %445 }
 0x1b1   :  { %v507_v54 = vpop.permute.xlu1 %506  ;;  %v1283_v3 = vpop.permute.xlu0 %470 }
 0x1b5   :  { %v461_v55 = vpop.permute.xlu1 %460  ;;  %v1287_v5 = vpop.permute.xlu0 %475 }
 0x1b9   :  { %v1268_v56 = vpop.permute.xlu1 %511  ;;  %v1291_v6 = vpop.permute.xlu0 %480 }
 0x1bd   :  { %v1270_v57 = vpop.permute.xlu1 %465 }
 0x1c1   :  { %v1272_v58 = vpop.permute.xlu1 %516 }
 0x1c3   :  { %536 = vperm.xlu0 %803, %v498_v50  }
 0x1f2   :  { %v353_v59 = vpop.xlane.xlu1 %352 }
 0x1f3   :  { %v362_v60 = vmul.f32 0.03125, %v353_v59 }
 0x1f5   :  { %v1275_v61 = vsub.f32 %v1177_v63, %v362_v60 }
 0x1f6   :  { %v1285_v4 = vpop.permute.xlu1 %521 }
 0x1f7   :  { %v378_v62 = vmul.f32 %v1275_v61, %v1275_v61 }
 0x1f9   :  { %v400_v0 = vsel %vm329_vm0, %v378_v62, 0.0 }
 0x1fa   :  { %401 = vadd.xlane.f32.xlu1 %v400_v0  ;;  %v1289_v63 = vpop.permute.xlu1 %526 }
 0x20b   :  { %531 = vperm.xlu1 %804, %v497_v1  }
 0x222   :  { %v381_v8 = vpop.xlane.xlu0 %380 }
 0x223   :  { %v403_v11 = vmul.f32 0.03125, %v381_v8 }
 0x225   :  { %v411_v15 = vadd.f32 1e-05, %v403_v11 }
 0x22a   :  { %v387_v12 = vpop.xlane.xlu0 %386 }
 0x22b   :  { %v384_v7 = vpop.xlane.xlu1 %383  ;;  %v405_v16 = vmul.f32 0.03125, %v387_v12 }
 0x22c   :  { %v404_v9 = vmul.f32 0.03125, %v384_v7 }
 0x22d   :  { %v413_v21 = vadd.f32 1e-05, %v405_v16 }
 0x22e   :  { %v412_v13 = vadd.f32 1e-05, %v404_v9 }
 0x22f   :  { %v390_v14 = vpop.xlane.xlu1 %389 }
 0x230   :  { %805 = vrsqrt.f32 %v412_v13  ;;  %v406_v17 = vmul.f32 0.03125, %v390_v14 }
 0x231   :  { %807 = vrsqrt.f32 %v411_v15 }
 0x232   :  { %v393_v20 = vpop.xlane.xlu0 %392  ;;  %v414_v23 = vadd.f32 1e-05, %v406_v17  ;;  %809 = vrsqrt.f32 %v413_v21 }
 0x233   :  { %v407_v25 = vmul.f32 0.03125, %v393_v20 }
 0x234   :  { %811 = vrsqrt.f32 %v414_v23 }
 0x235   :  { %v415_v10 = vadd.f32 1e-05, %v407_v25 }
 0x236   :  { %v396_v22 = vpop.xlane.xlu1 %395 }
 0x237   :  { %v408_v27 = vmul.f32 0.03125, %v396_v22  ;;  %813 = vrsqrt.f32 %v415_v10 }
 0x239   :  { %v416_v31 = vadd.f32 1e-05, %v408_v27 }
 0x23a   :  { %v399_v29 = vpop.xlane.xlu0 %398  ;;  %v806_v30 = vpop.eup %805 }
 0x23b   :  { %v409_v18 = vmul.f32 0.03125, %v399_v29  ;;  %v808_v33 = vpop.eup %807  ;;  %v428_v35 = vmul.f32 %v806_v30, %v1230_v24  ;;  %815 = vrsqrt.f32 %v416_v31  ;;  %v576_v29 = vld [vmem:[%s1351_s4 + $0x28] sm:$0xff] }
 0x23c   :  { %v427_v26 = vmul.f32 %v808_v33, %v1224_v19  ;;  %v810_v38 = vpop.eup %809 }
 0x23d   :  { %v417_v36 = vadd.f32 1e-05, %v409_v18  ;;  %v484_v39 = vmul.f32 %v451_v51, %v428_v35  ;;  %v429_v43 = vmul.f32 %v810_v38, %v1233_v28 }
 0x23e   :  { %v812_v40 = vpop.eup %811  ;;  %v483_v34 = vmul.f32 %v446_v2, %v427_v26 }
 0x23f   :  { %817 = vrsqrt.f32 %v417_v36  ;;  %v540_v44 = vadd.f32 %v507_v54, %v484_v39  ;;  %v430_v45 = vmul.f32 %v812_v40, %v1240_v32  ;;  %v485_v48 = vmul.f32 %v456_v52, %v429_v43  ;;  %v572_v52 = vld [vmem:[%s1351_s4 + $0x8] sm:$0xff]  ;;  %v577_v36 = vld [vmem:[%s1351_s4 + $0x30] sm:$0xff] }
 0x240   :  { %v539_v47 = vadd.f32 %v502_v53, %v483_v34 }
 0x241   :  { %v814_v42 = vpop.eup %813  ;;  %v556_v50 = vmul.f32 0.2, %v540_v44  ;;  %v486_v24 = vmul.f32 %v461_v55, %v430_v45  ;;  %vm548_vm1 = vcmp.gt.f32.partialorder %v540_v44, 0.0  ;;  %v541_v51 = vadd.f32 %v1268_v56, %v485_v48 }
 0x242   :  { %v431_v59 = vmul.f32 %v814_v42, %v1247_v37  ;;  %v555_v19 = vmul.f32 0.2, %v539_v47  ;;  %vm547_vm2 = vcmp.gt.f32.partialorder %v539_v47, 0.0  ;;  %v537_v34 = vpop.permute.xlu0 %536 }
 0x243   :  { %v564_v28 = vsel %vm548_vm1, %v540_v44, %v556_v50  ;;  %v542_v54 = vadd.f32 %v1272_v58, %v486_v24  ;;  %v557_v0 = vmul.f32 0.2, %v541_v51  ;;  %vm549_vm3 = vcmp.gt.f32.partialorder %v541_v51, 0.0 }
 0x244   :  { %v487_v32 = vmul.f32 %v1270_v57, %v431_v59  ;;  %v563_v37 = vsel %vm547_vm2, %v539_v47, %v555_v19  ;;  %v580_v2 = vmul.f32 %v572_v52, %v564_v28 }
 0x245   :  { %v816_v49 = vpop.eup %815  ;;  %v558_v57 = vmul.f32 0.2, %v542_v54  ;;  %vm550_vm4 = vcmp.gt.f32.partialorder %v542_v54, 0.0  ;;  %v565_v13 = vsel %vm549_vm3, %v541_v51, %v557_v0 }
 0x246   :  { %v432_v60 = vmul.f32 %v816_v49, %v1253_v41  ;;  %v571_v41 = vld [vmem:[%s1351_s4] sm:$0xff]  ;;  %v543_v7 = vadd.f32 %v1285_v4, %v487_v32  ;;  %v574_v4 = vld [vmem:[%s1351_s4 + $0x18] sm:$0xff] }
 0x247   :  { %v579_v9 = vmul.f32 %v571_v41, %v563_v37  ;;  %v566_v15 = vsel %vm550_vm4, %v542_v54, %v558_v57 }
 0x248   :  { %v488_v1 = vmul.f32 %v1283_v3, %v432_v60  ;;  %v573_v3 = vld [vmem:[%s1351_s4 + $0x10] sm:$0xff]  ;;  %v559_v14 = vmul.f32 0.2, %v543_v7  ;;  %vm551_vm5 = vcmp.gt.f32.partialorder %v543_v7, 0.0  ;;  %v582_v22 = vmul.f32 %v574_v4, %v566_v15 }
 0x249   :  { %v818_v62 = vpop.eup %817  ;;  %v581_v17 = vmul.f32 %v573_v3, %v565_v13 }
 0x24a   :  { %v433_v56 = vmul.f32 %v818_v62, %v1259_v46  ;;  %v544_v11 = vadd.f32 %v1289_v63, %v488_v1  ;;  %v588_v46 = vsel %vm329_vm0, %v580_v2, 0.0  ;;  %v587_v63 = vsel %vm329_vm0, %v579_v9, 0.0 }
 0x24b   :  { %v589_v21 = vadd.f32 %v588_v46, %v587_v63  ;;  %v567_v25 = vsel %vm551_vm5, %v543_v7, %v559_v14  ;;  %v590_v27 = vsel %vm329_vm0, %v581_v17, 0.0  ;;  %v592_v18 = vsel %vm329_vm0, %v582_v22, 0.0 }
 0x24c   :  { %v489_v12 = vmul.f32 %v1287_v5, %v433_v56  ;;  %v560_v20 = vmul.f32 0.2, %v544_v11  ;;  %vm552_vm6 = vcmp.gt.f32.partialorder %v544_v11, 0.0  ;;  %v575_v5 = vld [vmem:[%s1351_s4 + $0x20] sm:$0xff] }
 0x24d   :  { %v591_v30 = vadd.f32 %v590_v27, %v589_v21  ;;  %v583_v33 = vmul.f32 %v575_v5, %v567_v25 }
 0x24e   :  { %v568_v10 = vsel %vm552_vm6, %v544_v11, %v560_v20 }
 0x24f   :  { %v584_v38 = vmul.f32 %v576_v29, %v568_v10  ;;  %v593_v40 = vadd.f32 %v592_v18, %v591_v30  ;;  %v594_v44 = vsel %vm329_vm0, %v583_v33, 0.0 }
 0x251   :  { %v596_v42 = vsel %vm329_vm0, %v584_v38, 0.0  ;;  %v595_v47 = vadd.f32 %v594_v44, %v593_v40 }
 0x253   :  { %v597_v50 = vadd.f32 %v596_v42, %v595_v47 }
 0x287   :  { %v402_v53 = vpop.xlane.xlu1 %401 }
 0x288   :  { %v410_v55 = vmul.f32 0.03125, %v402_v53  ;;  %v608_v53 = vld [vmem:[%s1352_s5] sm:$0x3] }
 0x28a   :  { %v418_v58 = vadd.f32 1e-05, %v410_v55 }
 0x28b   :  { %v532_v8 = vpop.permute.xlu1 %531 }
 0x28c   :  { %819 = vrsqrt.f32 %v418_v58  ;;  %v545_v16 = vadd.f32 %v532_v8, %v489_v12 }
 0x28e   :  { %v561_v23 = vmul.f32 0.2, %v545_v16  ;;  %vm553_vm7 = vcmp.gt.f32.partialorder %v545_v16, 0.0 }
 0x290   :  { %v569_v26 = vsel %vm553_vm7, %v545_v16, %v561_v23 }
 0x291   :  { %v585_v43 = vmul.f32 %v577_v36, %v569_v26 }
 0x293   :  { %v598_v49 = vsel %vm329_vm0, %v585_v43, 0.0 }
 0x294   :  { %v599_v59 = vadd.f32 %v598_v49, %v597_v50 }
 0x296   :  { %v820_v31 = vpop.eup %819 }
 0x297   :  { %v434_v35 = vmul.f32 %v820_v31, %v1275_v61  ;;  %v578_v61 = vld [vmem:[%s1351_s4 + $0x38] sm:$0xff] }
 0x299   :  { %v490_v39 = vmul.f32 %v1291_v6, %v434_v35 }
 0x29b   :  { %v546_v45 = vadd.f32 %v537_v34, %v490_v39 }
 0x29d   :  { %vm554_vm8 = vcmp.gt.f32.partialorder %v546_v45, 0.0  ;;  %v562_v48 = vmul.f32 0.2, %v546_v45 }
 0x29f   :  { %v570_v24 = vsel %vm554_vm8, %v546_v45, %v562_v48 }
 0x2a0   :  { %v586_v6 = vmul.f32 %v578_v61, %v570_v24 }
 0x2a2   :  { %v600_v19 = vsel %vm329_vm0, %v586_v6, 0.0 }
 0x2a3   :  { %v601_v51 = vadd.f32 %v600_v19, %v599_v59 }
 0x2a5   :  { %v602_v60 = vrot.slane %v601_v51, 4 }
 0x2a7   :  { %v603_v62 = vadd.f32 %v602_v60, %v601_v51 }
 0x2a9   :  { %v604_v28 = vrot.slane %v603_v62, 2 }
 0x2ab   :  { %v605_v54 = vadd.f32 %v604_v28, %v603_v62 }
 0x2ad   :  { %v606_v32 = vrot.slane %v605_v54, 1 }
 0x2af   :  { %v607_v52 = vadd.f32 %v606_v32, %v605_v54 }
 0x2b1   :  { %v609_v55 = vmul.f32 %v608_v53, %v607_v52 }
 0x2b3   :  { %v611_v37 = vsel %vm610_vm9, %v609_v55, 0.0 }
 0x2b4   :  { %612 = vadd.xlane.f32.xlu1 %v611_v37 }
 0x341   :  { %v613_v0 = vpop.xlane.xlu1 %612 }
 0x342   :  { %v614_v1 = vsub.f32 0.0, %v613_v0 }
 0x344   :  { %v615_v41 = vmul.f32 1.442695, %v614_v1 }
 0x346   :  { %821 = vpow2.f32 %v615_v41 }
 0x350   :  { %v822_v56 = vpop.eup %821 }
 0x351   :  { %v617_v58 = vadd.f32 1.0, %v822_v56 }
 0x353   :  { %823 = vrcp.f32 %v617_v58 }
 0x35d   :  { %v824_v2 = vpop.eup %823 }
 0x35e   :  { %621 = vst.msk [vmem:[%s1353_s6] sm:$0x3] %vm620_vm10, %v824_v2 }

</bundles_post_ra>
